<compile_context>
chip_gen: v5e
topology: v5e:2x2
jax: 0.10.0
libtpu: 0.0.40
codegen_flags: <defaults>
</compile_context>

<pallas_src>
import jax
import jax.numpy as jnp
from jax.experimental import pallas as pl
from jax.experimental.pallas import tpu as pltpu

D_IN = 32 * 32            # 1024
H1_RAW, H1 = 400, 512     # mlp1 out, padded to a multiple of 128
H2 = 128                  # mlp2 out (already lane-aligned)
OUT_RAW, OUT = 10, 128    # last_layer out, padded to a multiple of 128


def _round_up(x, m):
    return ((x + m - 1) // m) * m


def _choose_tb(batch):
    """Pick the batch tile.

    - batch < 1024: one tile, padded only to the sublane multiple (8), so tiny
      inference batches don't pay a 128x pad/compute blow-up.
    - batch >= 1024: ~512-1024-row tiles (>= 2 of them) to amortize per-step
      pipeline overhead and give the v7x 'parallel' axis work for both TCs.
    """
    b8 = _round_up(max(batch, 1), 8)
    if b8 < 1024:
        return b8
    n_tiles = max(2, pl.cdiv(b8, 1024))
    return _round_up(pl.cdiv(b8, n_tiles), 8)


def mlp_kernel(x_ref, w1_ref, b1_ref, w2_ref, b2_ref, w3_ref, b3_ref, out_ref):
    # Activation tile arrives f32; cast to bf16 after the load (no separate
    # wrapper-side cast pass). All dots are bf16 x bf16 with f32 accumulation.
    x = x_ref[...].astype(jnp.bfloat16)                                    # (tb, 1024)
    y = jnp.dot(x, w1_ref[...],
                preferred_element_type=jnp.float32) + b1_ref[...]          # (tb, 512)
    # PyTorch forward feeds the *pre-ReLU* y into mlp2 (its relu is dead code).
    z = jnp.dot(y.astype(jnp.bfloat16), w2_ref[...],
                preferred_element_type=jnp.float32) + b2_ref[...]          # (tb, 128)
    z = jnp.maximum(z, 0.0)
    a = jnp.dot(z.astype(jnp.bfloat16), w3_ref[...],
                preferred_element_type=jnp.float32) + b3_ref[...]          # (tb, 128)
    out_ref[...] = a.astype(out_ref.dtype)                                 # bf16 store


@jax.jit
def mlp_forward(x_nchw, params):
    """params: padded/cast params from prepare_params()."""
    w1, b1, w2, b2, w3, b3 = params
    batch = x_nchw.shape[0]
    x_flat = x_nchw.reshape(batch, -1)           # (B, 1024) f32 — no wrapper cast

    tb = _choose_tb(batch)
    n_tiles = pl.cdiv(batch, tb)
    b_pad = n_tiles * tb
    if b_pad != batch:                           # at most a few rows of padding
        x_flat = jnp.pad(x_flat, ((0, b_pad - batch), (0, 0)))

    resident = lambda i: (0, 0)   # weights/biases: same block every grid step
    # Note: resident specs could take pipeline_mode=pl.Buffered(1) to skip
    # double-buffering (~1.3 MiB saved), but the default VMEM budget already
    # has ample headroom, so we keep the compile-safe default here.

    flops = 2 * b_pad * (D_IN * H1 + H1 * H2 + H2 * OUT)
    bytes_accessed = (x_flat.size * 4 + b_pad * OUT * 2
                      + (w1.size + w2.size + w3.size) * 2
                      + (b1.size + b2.size + b3.size) * 4)

    out = pl.pallas_call(
        mlp_kernel,
        out_shape=jax.ShapeDtypeStruct((b_pad, OUT), jnp.bfloat16),
        grid=(n_tiles,),
        in_specs=[
            pl.BlockSpec((tb, D_IN), lambda i: (i, 0)),   # activations pipeline
            pl.BlockSpec((D_IN, H1), resident),
            pl.BlockSpec((1, H1), resident),
            pl.BlockSpec((H1, H2), resident),
            pl.BlockSpec((1, H2), resident),
            pl.BlockSpec((H2, OUT), resident),
            pl.BlockSpec((1, OUT), resident),
        ],
        out_specs=pl.BlockSpec((tb, OUT), lambda i: (i, 0)),
        compiler_params=pltpu.CompilerParams(
            dimension_semantics=("parallel",),    # shard batch tiles across TCs
            # no vmem_limit override: ~10-16 MiB footprint even at tb=1024 fits
            # the default scoped limit on v5e/v6e/v7x.
        ),
        cost_estimate=pl.CostEstimate(
            flops=flops, transcendentals=0, bytes_accessed=bytes_accessed),
    )(x_flat, w1, b1, w2, b2, w3, b3)

    # Unpad inside the jit so the slice fuses with the surrounding program.
    return out[:batch, :OUT_RAW]


def init_params(key):
    """Deterministic init mirroring nn.Linear shapes (weights stored transposed)."""
    def linear(key, fan_in, fan_out):
        kw, kb = jax.random.split(key)
        bound = 1.0 / jnp.sqrt(fan_in)
        w = jax.random.uniform(kw, (fan_in, fan_out), jnp.float32, -bound, bound)
        b = jax.random.uniform(kb, (1, fan_out), jnp.float32, -bound, bound)
        return w, b

    k1, k2, k3 = jax.random.split(key, 3)
    w1, b1 = linear(k1, D_IN, H1_RAW)      # mlp1:       1024 -> 400
    w2, b2 = linear(k2, H1_RAW, H2)        # mlp2:        400 -> 128
    w3, b3 = linear(k3, H2, OUT_RAW)       # last_layer:  128 -> 10
    return (w1, b1, w2, b2, w3, b3)


def prepare_params(raw):
    """Zero-pad to MXU/lane-aligned shapes and cast weights to bf16.

    Invariant: W3/b3 padding columns are zero, so padded output columns 10..127
    are exactly zero and out[:, :10] is exact.
    """
    w1, b1, w2, b2, w3, b3 = raw
    w1p = jnp.pad(w1, ((0, 0), (0, H1 - H1_RAW))).astype(jnp.bfloat16)   # (1024, 512)
    b1p = jnp.pad(b1, ((0, 0), (0, H1 - H1_RAW)))                        # (1, 512) f32
    w2p = jnp.pad(w2, ((0, H1 - H1_RAW), (0, 0))).astype(jnp.bfloat16)   # (512, 128)
    b2p = b2                                                             # (1, 128) f32
    w3p = jnp.pad(w3, ((0, 0), (0, OUT - OUT_RAW))).astype(jnp.bfloat16) # (128, 128)
    b3p = jnp.pad(b3, ((0, 0), (0, OUT - OUT_RAW)))                      # (1, 128) f32
    return (w1p, b1p, w2p, b2p, w3p, b3p)


if __name__ == "__main__":
    key = jax.random.PRNGKey(0)
    k_params, k_x = jax.random.split(key)

    raw_params = init_params(k_params)
    params = prepare_params(raw_params)

    # Small input consistent with flatten(start_dim=1) -> 1024 features.
    x = jax.random.normal(k_x, (2, 1, 32, 32), dtype=jnp.float32)

    out = mlp_forward(x, params)
    jax.block_until_ready(out)

    # Reference with the same bf16-rounded operands (f32 math, highest precision)
    # so the comparison isolates kernel correctness from quantization error.
    w1p, b1p, w2p, b2p, w3p, b3p = params
    hp = jax.lax.Precision.HIGHEST
    xf = x.reshape(x.shape[0], -1).astype(jnp.bfloat16).astype(jnp.float32)
    y_ref = jnp.dot(xf, w1p.astype(jnp.float32), precision=hp) + b1p
    z_ref = jnp.dot(y_ref.astype(jnp.bfloat16).astype(jnp.float32),
                    w2p.astype(jnp.float32), precision=hp) + b2p
    z_ref = jnp.maximum(z_ref, 0.0)
    a_ref = jnp.dot(z_ref.astype(jnp.bfloat16).astype(jnp.float32),
                    w3p.astype(jnp.float32), precision=hp) + b3p
    a_ref = a_ref[:, :OUT_RAW]

    assert out.shape == (2, OUT_RAW)
    out_f32 = out.astype(jnp.float32)
    max_err = float(jnp.max(jnp.abs(out_f32 - a_ref)))
    assert jnp.allclose(out_f32, a_ref, atol=1e-2, rtol=1e-2), max_err

    print("KERNEL_OK")
</pallas_src>

<mosaic_0001>
module attributes {stable_mosaic.version = 11 : i64} {
  func.func @mlp_kernel(%arg0: i32, %arg1: memref<8x1024xf32, #tpu.memory_space<vmem>>, %arg2: memref<1024x512xbf16, #tpu.memory_space<vmem>>, %arg3: memref<1x512xf32, #tpu.memory_space<vmem>>, %arg4: memref<512x128xbf16, #tpu.memory_space<vmem>>, %arg5: memref<1x128xf32, #tpu.memory_space<vmem>>, %arg6: memref<128x128xbf16, #tpu.memory_space<vmem>>, %arg7: memref<1x128xf32, #tpu.memory_space<vmem>>, %arg8: memref<8x128xbf16, #tpu.memory_space<vmem>>) attributes {dimension_semantics = [#tpu.dimension_semantics<parallel>], iteration_bounds = array<i64: 1>, scalar_prefetch = 0 : i64, scratch_operands = 0 : i64, tpu.core_type = #tpu.core_type<tc>, window_params = [{transform_indices = @transform_0, window_bounds = array<i64: 8, 1024>}, {pipeline_mode = #tpu.pipeline_mode<synchronous>, transform_indices = @transform_1, window_bounds = array<i64: 1024, 512>}, {pipeline_mode = #tpu.pipeline_mode<synchronous>, transform_indices = @transform_2, window_bounds = array<i64: 1, 512>}, {pipeline_mode = #tpu.pipeline_mode<synchronous>, transform_indices = @transform_3, window_bounds = array<i64: 512, 128>}, {pipeline_mode = #tpu.pipeline_mode<synchronous>, transform_indices = @transform_4, window_bounds = array<i64: 1, 128>}, {pipeline_mode = #tpu.pipeline_mode<synchronous>, transform_indices = @transform_5, window_bounds = array<i64: 128, 128>}, {pipeline_mode = #tpu.pipeline_mode<synchronous>, transform_indices = @transform_6, window_bounds = array<i64: 1, 128>}, {transform_indices = @transform_7, window_bounds = array<i64: 8, 128>}]} {
    %c0 = arith.constant 0 : index
    %c0_0 = arith.constant 0 : index
    %0 = vector.load %arg1[%c0, %c0_0] : memref<8x1024xf32, #tpu.memory_space<vmem>>, vector<8x1024xf32>
    %1 = arith.truncf %0 : vector<8x1024xf32> to vector<8x1024xbf16>
    %c0_1 = arith.constant 0 : index
    %c0_2 = arith.constant 0 : index
    %2 = vector.load %arg2[%c0_1, %c0_2] : memref<1024x512xbf16, #tpu.memory_space<vmem>>, vector<1024x512xbf16>
    %cst = arith.constant dense<0.000000e+00> : vector<8x512xf32>
    %3 = tpu.matmul %1, %2, %cst {dimension_numbers = #tpu.dot_dimension_numbers<[1], [0], [0], [1], [0, 0, 1, 1], [], []>} : vector<8x1024xbf16>, vector<1024x512xbf16>, vector<8x512xf32> -> vector<8x512xf32>
    %c0_3 = arith.constant 0 : index
    %c0_4 = arith.constant 0 : index
    %4 = vector.load %arg3[%c0_3, %c0_4] : memref<1x512xf32, #tpu.memory_space<vmem>>, vector<1x512xf32>
    %5 = vector.broadcast %4 : vector<1x512xf32> to vector<8x512xf32>
    %6 = arith.addf %3, %5 : vector<8x512xf32>
    %7 = arith.truncf %6 : vector<8x512xf32> to vector<8x512xbf16>
    %c0_5 = arith.constant 0 : index
    %c0_6 = arith.constant 0 : index
    %8 = vector.load %arg4[%c0_5, %c0_6] : memref<512x128xbf16, #tpu.memory_space<vmem>>, vector<512x128xbf16>
    %cst_7 = arith.constant dense<0.000000e+00> : vector<8x128xf32>
    %9 = tpu.matmul %7, %8, %cst_7 {dimension_numbers = #tpu.dot_dimension_numbers<[1], [0], [0], [1], [0, 0, 1, 1], [], []>} : vector<8x512xbf16>, vector<512x128xbf16>, vector<8x128xf32> -> vector<8x128xf32>
    %c0_8 = arith.constant 0 : index
    %c0_9 = arith.constant 0 : index
    %10 = vector.load %arg5[%c0_8, %c0_9] : memref<1x128xf32, #tpu.memory_space<vmem>>, vector<1x128xf32>
    %11 = vector.broadcast %10 : vector<1x128xf32> to vector<8x128xf32>
    %12 = arith.addf %9, %11 : vector<8x128xf32>
    %cst_10 = arith.constant 0.000000e+00 : f32
    %13 = vector.broadcast %cst_10 : f32 to vector<8x128xf32>
    %14 = arith.maximumf %12, %13 : vector<8x128xf32>
    %15 = arith.truncf %14 : vector<8x128xf32> to vector<8x128xbf16>
    %c0_11 = arith.constant 0 : index
    %c0_12 = arith.constant 0 : index
    %16 = vector.load %arg6[%c0_11, %c0_12] : memref<128x128xbf16, #tpu.memory_space<vmem>>, vector<128x128xbf16>
    %cst_13 = arith.constant dense<0.000000e+00> : vector<8x128xf32>
    %17 = tpu.matmul %15, %16, %cst_13 {dimension_numbers = #tpu.dot_dimension_numbers<[1], [0], [0], [1], [0, 0, 1, 1], [], []>} : vector<8x128xbf16>, vector<128x128xbf16>, vector<8x128xf32> -> vector<8x128xf32>
    %c0_14 = arith.constant 0 : index
    %c0_15 = arith.constant 0 : index
    %18 = vector.load %arg7[%c0_14, %c0_15] : memref<1x128xf32, #tpu.memory_space<vmem>>, vector<1x128xf32>
    %19 = vector.broadcast %18 : vector<1x128xf32> to vector<8x128xf32>
    %20 = arith.addf %17, %19 : vector<8x128xf32>
    %21 = arith.truncf %20 : vector<8x128xf32> to vector<8x128xbf16>
    %c0_16 = arith.constant 0 : index
    %c0_17 = arith.constant 0 : index
    %22 = vector.load %arg8[%c0_16, %c0_17] : memref<8x128xbf16, #tpu.memory_space<vmem>>, vector<8x128xbf16>
    tpu.vector_store %arg8[%c0_16, %c0_17], %21 {strides = array<i32>} : memref<8x128xbf16, #tpu.memory_space<vmem>>, vector<8x128xbf16>,
    return
  }
  func.func @transform_0(%arg0: i32) -> (i32, i32) {
    %c0_i32 = arith.constant 0 : i32
    %c0_i32_0 = arith.constant 0 : i32
    return %arg0, %c0_i32 : i32, i32
  }
  func.func @transform_1(%arg0: i32) -> (i32, i32) {
    %c0_i32 = arith.constant 0 : i32
    %c0_i32_0 = arith.constant 0 : i32
    %c0_i32_1 = arith.constant 0 : i32
    return %c0_i32, %c0_i32_0 : i32, i32
  }
  func.func @transform_2(%arg0: i32) -> (i32, i32) {
    %c0_i32 = arith.constant 0 : i32
    %c0_i32_0 = arith.constant 0 : i32
    %c0_i32_1 = arith.constant 0 : i32
    return %c0_i32, %c0_i32_0 : i32, i32
  }
  func.func @transform_3(%arg0: i32) -> (i32, i32) {
    %c0_i32 = arith.constant 0 : i32
    %c0_i32_0 = arith.constant 0 : i32
    %c0_i32_1 = arith.constant 0 : i32
    return %c0_i32, %c0_i32_0 : i32, i32
  }
  func.func @transform_4(%arg0: i32) -> (i32, i32) {
    %c0_i32 = arith.constant 0 : i32
    %c0_i32_0 = arith.constant 0 : i32
    %c0_i32_1 = arith.constant 0 : i32
    return %c0_i32, %c0_i32_0 : i32, i32
  }
  func.func @transform_5(%arg0: i32) -> (i32, i32) {
    %c0_i32 = arith.constant 0 : i32
    %c0_i32_0 = arith.constant 0 : i32
    %c0_i32_1 = arith.constant 0 : i32
    return %c0_i32, %c0_i32_0 : i32, i32
  }
  func.func @transform_6(%arg0: i32) -> (i32, i32) {
    %c0_i32 = arith.constant 0 : i32
    %c0_i32_0 = arith.constant 0 : i32
    %c0_i32_1 = arith.constant 0 : i32
    return %c0_i32, %c0_i32_0 : i32, i32
  }
  func.func @transform_7(%arg0: i32) -> (i32, i32) {
    %c0_i32 = arith.constant 0 : i32
    %c0_i32_0 = arith.constant 0 : i32
    return %arg0, %c0_i32 : i32, i32
  }
}

</mosaic_0001>

<bundles_post_ra>
// kernel: mlp_forward.1
= control target key start
LH: loop header
LB: loop body
LE: loop exit
PB: predicated region body
PF: predicated region fallthrough
CT: control target
= control target key end

     0   :  { %12 = vsyncpa [#allocation3], 0  ;;  %s4168_s0 = inlined_call_operand.vmem [shape: f32[8,1024], index: 0, kind: input, shape index: {}]   ;;  %s4169_s1 = inlined_call_operand.hbm [shape: bf16[1024,512], index: 1, kind: input, shape index: {}]   ;;  %s4170_s2 = inlined_call_operand.vmem [shape: f32[1,512], index: 2, kind: input, shape index: {}]   ;;  %s4171_s3 = inlined_call_operand.hbm [shape: bf16[512,128], index: 3, kind: input, shape index: {}]   ;;  %s4172_s4 = inlined_call_operand.vmem [shape: f32[1,128], index: 4, kind: input, shape index: {}]   ;;  %s4173_s5 = inlined_call_operand.vmem [shape: bf16[128,128], index: 5, kind: input, shape index: {}]   ;;  %s4174_s6 = inlined_call_operand.vmem [shape: f32[1,128], index: 6, kind: input, shape index: {}]   ;;  %s4175_s7 = inlined_call_operand.vmem [shape: bf16[8,128], index: 7, kind: output, shape index: {}]  }
   0x1   :  { %s20_s26 = sshll.u32 %s4169_s1, 4  ;;  %s21_s26 = int_to_ptr.hbm [resolvable:$true] %s20_s26 }
   0x2   :  { %13 = vsyncpa [#allocation5], 0  ;;  %s3983_s27 = smov [#allocation2]   ;;  %s35_s8 = sshll.u32 %s4171_s3, 4  ;;  %s36_s8 = int_to_ptr.hbm [resolvable:$true] %s35_s8 }
   0x3   :  { %s22_s28 = sshll.u32 %s3983_s27, 4  ;;  %s3984_s9 = smov 256   ;;  %s23_s28 = int_to_ptr.vmem [resolvable:$true] %s22_s28 }
   0x4   :  { %s3985_s10 = smov 16   ;;  %s3986_s11 = smov [#allocation4]  }
   0x5   :  { %28 = dma.hbm_to_vmem [thread:$0]  %s21_s26, 32768, %s23_s28, [#allocation3], %s3984_s9, %s3984_s9, %s3985_s10  }
   0x6   :  { %s37_s12 = sshll.u32 %s3986_s11, 4  ;;  %s3987_s13 = smov 64   ;;  %s38_s12 = int_to_ptr.vmem [resolvable:$true] %s37_s12 }
   0x7   :  { %s3988_s14 = smov 4  }
   0x8   :  { %43 = dma.hbm_to_vmem [thread:$0]  %s36_s8, 4096, %s38_s12, [#allocation5], %s3987_s13, %s3987_s13, %s3988_s14  }
   0x9   :  { %3979 = dma.done.wait [#allocation3], 32768  }
   0xa   :  { %3980 = vsyncadd [#allocation3], 4294934528 }
   0xb   :  { %3981 = dma.done.wait [#allocation5], 4096  }
   0xc   :  { %3982 = vsyncadd [#allocation5], 4294963200  ;;  %v2557_v0 = vld [vmem:[#allocation2 + $0xe0] sm:$0xf]  ;;  %v3657_v1 = vld [vmem:[#allocation2 + $0xec] sm:$0xf0] }
   0xd   :  { %v2685_v2 = vld [vmem:[#allocation2 + $0x1e0] sm:$0xf]  ;;  %v2558_v3 = vor.u32 %v3657_v1, %v2557_v0  ;;  %v3689_v4 = vld [vmem:[#allocation2 + $0x1ec] sm:$0xf0] }
   0xe   :  { %v2813_v5 = vld [vmem:[#allocation2 + $0x2e0] sm:$0xf]  ;;  %v3721_v6 = vld [vmem:[#allocation2 + $0x2ec] sm:$0xf0]  ;;  %v2686_v7 = vor.u32 %v3689_v4, %v2685_v2 }
   0xf   :  { %v2814_v8 = vor.u32 %v3721_v6, %v2813_v5  ;;  %v2941_v9 = vld [vmem:[#allocation2 + $0x3e0] sm:$0xf]  ;;  %v3753_v10 = vld [vmem:[#allocation2 + $0x3ec] sm:$0xf0]  ;;  %1620 = vmatpush.bf16.msra.mxu0 %v2558_v3 }
  0x10   :  { %v2541_v11 = vld [vmem:[#allocation2 + $0xc0] sm:$0xf]  ;;  %v2942_v12 = vor.u32 %v3753_v10, %v2941_v9  ;;  %v3653_v13 = vld [vmem:[#allocation2 + $0xcc] sm:$0xf0]  ;;  %1633 = vmatpush.bf16.msra.mxu1 %v2686_v7 }
  0x11   :  { %v2669_v14 = vld [vmem:[#allocation2 + $0x1c0] sm:$0xf]  ;;  %v3685_v15 = vld [vmem:[#allocation2 + $0x1cc] sm:$0xf0]  ;;  %1646 = vmatpush.bf16.msra.mxu2 %v2814_v8  ;;  %v2542_v16 = vor.u32 %v3653_v13, %v2541_v11 }
  0x12   :  { %v2670_v17 = vor.u32 %v3685_v15, %v2669_v14  ;;  %v2797_v18 = vld [vmem:[#allocation2 + $0x2c0] sm:$0xf]  ;;  %v3717_v19 = vld [vmem:[#allocation2 + $0x2cc] sm:$0xf0]  ;;  %1659 = vmatpush.bf16.msra.mxu3 %v2942_v12 }
  0x13   :  { %v2925_v20 = vld [vmem:[#allocation2 + $0x3c0] sm:$0xf]  ;;  %v2798_v21 = vor.u32 %v3717_v19, %v2797_v18  ;;  %v3749_v22 = vld [vmem:[#allocation2 + $0x3cc] sm:$0xf0]  ;;  %1621 = vmatpush.bf16.msra.mxu0 %v2542_v16 }
  0x14   :  { %v2525_v23 = vld [vmem:[#allocation2 + $0xa0] sm:$0xf]  ;;  %v3649_v24 = vld [vmem:[#allocation2 + $0xac] sm:$0xf0]  ;;  %v2926_v25 = vor.u32 %v3749_v22, %v2925_v20  ;;  %1634 = vmatpush.bf16.msra.mxu1 %v2670_v17 }
  0x15   :  { %v2653_v26 = vld [vmem:[#allocation2 + $0x1a0] sm:$0xf]  ;;  %v3681_v27 = vld [vmem:[#allocation2 + $0x1ac] sm:$0xf0]  ;;  %v2526_v29 = vor.u32 %v3649_v24, %v2525_v23  ;;  %1647 = vmatpush.bf16.msra.mxu2 %v2798_v21 }
  0x16   :  { %v2781_v28 = vld [vmem:[#allocation2 + $0x2a0] sm:$0xf]  ;;  %v3713_v30 = vld [vmem:[#allocation2 + $0x2ac] sm:$0xf0]  ;;  %v2654_v33 = vor.u32 %v3681_v27, %v2653_v26  ;;  %1660 = vmatpush.bf16.msra.mxu3 %v2926_v25 }
  0x17   :  { %v2909_v31 = vld [vmem:[#allocation2 + $0x3a0] sm:$0xf]  ;;  %v3745_v32 = vld [vmem:[#allocation2 + $0x3ac] sm:$0xf0]  ;;  %v2782_v34 = vor.u32 %v3713_v30, %v2781_v28  ;;  %1622 = vmatpush.bf16.msra.mxu0 %v2526_v29 }
  0x18   :  { %v2509_v35 = vld [vmem:[#allocation2 + $0x80] sm:$0xf]  ;;  %v3645_v36 = vld [vmem:[#allocation2 + $0x8c] sm:$0xf0]  ;;  %v2910_v38 = vor.u32 %v3745_v32, %v2909_v31  ;;  %1635 = vmatpush.bf16.msra.mxu1 %v2654_v33 }
  0x19   :  { %v2637_v37 = vld [vmem:[#allocation2 + $0x180] sm:$0xf]  ;;  %v3677_v39 = vld [vmem:[#allocation2 + $0x18c] sm:$0xf0]  ;;  %v2510_v44 = vor.u32 %v3645_v36, %v2509_v35  ;;  %1648 = vmatpush.bf16.msra.mxu2 %v2782_v34 }
  0x1a   :  { %v2765_v40 = vld [vmem:[#allocation2 + $0x280] sm:$0xf]  ;;  %v3709_v41 = vld [vmem:[#allocation2 + $0x28c] sm:$0xf0]  ;;  %v2638_v45 = vor.u32 %v3677_v39, %v2637_v37  ;;  %1661 = vmatpush.bf16.msra.mxu3 %v2910_v38 }
  0x1b   :  { %v2893_v42 = vld [vmem:[#allocation2 + $0x380] sm:$0xf]  ;;  %v3741_v43 = vld [vmem:[#allocation2 + $0x38c] sm:$0xf0]  ;;  %v2766_v46 = vor.u32 %v3709_v41, %v2765_v40  ;;  %1623 = vmatpush.bf16.msra.mxu0 %v2510_v44 }
  0x1c   :  { %v2493_v47 = vld [vmem:[#allocation2 + $0x60] sm:$0xf]  ;;  %v3641_v48 = vld [vmem:[#allocation2 + $0x6c] sm:$0xf0]  ;;  %v2894_v50 = vor.u32 %v3741_v43, %v2893_v42  ;;  %1636 = vmatpush.bf16.msra.mxu1 %v2638_v45 }
  0x1d   :  { %v2621_v49 = vld [vmem:[#allocation2 + $0x160] sm:$0xf]  ;;  %v3673_v51 = vld [vmem:[#allocation2 + $0x16c] sm:$0xf0]  ;;  %v2494_v56 = vor.u32 %v3641_v48, %v2493_v47  ;;  %1649 = vmatpush.bf16.msra.mxu2 %v2766_v46 }
  0x1e   :  { %v2749_v52 = vld [vmem:[#allocation2 + $0x260] sm:$0xf]  ;;  %v3705_v53 = vld [vmem:[#allocation2 + $0x26c] sm:$0xf0]  ;;  %v2622_v57 = vor.u32 %v3673_v51, %v2621_v49  ;;  %1662 = vmatpush.bf16.msra.mxu3 %v2894_v50 }
  0x1f   :  { %v2877_v54 = vld [vmem:[#allocation2 + $0x360] sm:$0xf]  ;;  %v3737_v55 = vld [vmem:[#allocation2 + $0x36c] sm:$0xf0]  ;;  %v2750_v58 = vor.u32 %v3705_v53, %v2749_v52  ;;  %1624 = vmatpush.bf16.msra.mxu0 %v2494_v56 }
  0x20   :  { %v2477_v59 = vld [vmem:[#allocation2 + $0x40] sm:$0xf]  ;;  %v3637_v60 = vld [vmem:[#allocation2 + $0x4c] sm:$0xf0]  ;;  %v2878_v62 = vor.u32 %v3737_v55, %v2877_v54  ;;  %1637 = vmatpush.bf16.msra.mxu1 %v2622_v57 }
  0x21   :  { %v2605_v61 = vld [vmem:[#allocation2 + $0x140] sm:$0xf]  ;;  %v3669_v63 = vld [vmem:[#allocation2 + $0x14c] sm:$0xf0]  ;;  %v2478_v4 = vor.u32 %v3637_v60, %v2477_v59  ;;  %1650 = vmatpush.bf16.msra.mxu2 %v2750_v58 }
  0x22   :  { %v2733_v0 = vld [vmem:[#allocation2 + $0x240] sm:$0xf]  ;;  %v3701_v1 = vld [vmem:[#allocation2 + $0x24c] sm:$0xf0]  ;;  %v2606_v5 = vor.u32 %v3669_v63, %v2605_v61  ;;  %1663 = vmatpush.bf16.msra.mxu3 %v2878_v62 }
  0x23   :  { %v2861_v2 = vld [vmem:[#allocation2 + $0x340] sm:$0xf]  ;;  %v3733_v3 = vld [vmem:[#allocation2 + $0x34c] sm:$0xf0]  ;;  %v2734_v6 = vor.u32 %v3701_v1, %v2733_v0  ;;  %1625 = vmatpush.bf16.msra.mxu0 %v2478_v4 }
  0x24   :  { %v2461_v7 = vld [vmem:[#allocation2 + $0x20] sm:$0xf]  ;;  %v3633_v8 = vld [vmem:[#allocation2 + $0x2c] sm:$0xf0]  ;;  %v2862_v10 = vor.u32 %v3733_v3, %v2861_v2  ;;  %1638 = vmatpush.bf16.msra.mxu1 %v2606_v5 }
  0x25   :  { %v2589_v9 = vld [vmem:[#allocation2 + $0x120] sm:$0xf]  ;;  %v3665_v11 = vld [vmem:[#allocation2 + $0x12c] sm:$0xf0]  ;;  %v2462_v16 = vor.u32 %v3633_v8, %v2461_v7  ;;  %1651 = vmatpush.bf16.msra.mxu2 %v2734_v6 }
  0x26   :  { %v2717_v12 = vld [vmem:[#allocation2 + $0x220] sm:$0xf]  ;;  %v3697_v13 = vld [vmem:[#allocation2 + $0x22c] sm:$0xf0]  ;;  %v2590_v19 = vor.u32 %v3665_v11, %v2589_v9  ;;  %1664 = vmatpush.bf16.msra.mxu3 %v2862_v10  ;;  %v61_v10 = vld [vmem:[%s4168_s0 + $0x18] sm:$0xff] }
  0x27   :  { %v2845_v14 = vld [vmem:[#allocation2 + $0x320] sm:$0xf]  ;;  %v3729_v15 = vld [vmem:[#allocation2 + $0x32c] sm:$0xf0]  ;;  %v2718_v20 = vor.u32 %v3697_v13, %v2717_v12  ;;  %1626 = vmatpush.bf16.msra.mxu0 %v2462_v16 }
  0x28   :  { %v2445_v17 = vld [vmem:[#allocation2] sm:$0xf]  ;;  %v3629_v18 = vld [vmem:[#allocation2 + $0xc] sm:$0xf0]  ;;  %v2846_v24 = vor.u32 %v3729_v15, %v2845_v14  ;;  %1639 = vmatpush.bf16.msra.mxu1 %v2590_v19  ;;  %v4048_v15 = vpack.c.bf16 %v61_v10, %v61_v10  ;;  %v59_v19 = vld [vmem:[%s4168_s0 + $0x8] sm:$0xff] }
  0x29   :  { %v2573_v21 = vld [vmem:[#allocation2 + $0x100] sm:$0xf]  ;;  %v3661_v22 = vld [vmem:[#allocation2 + $0x10c] sm:$0xf0]  ;;  %v2446_v31 = vor.u32 %v3629_v18, %v2445_v17  ;;  %1652 = vmatpush.bf16.msra.mxu2 %v2718_v20  ;;  %v2687_v10 = vld [vmem:[#allocation2 + $0x1f0] sm:$0xf0] }
  0x2a   :  { %v2701_v23 = vld [vmem:[#allocation2 + $0x200] sm:$0xf]  ;;  %v3693_v25 = vld [vmem:[#allocation2 + $0x20c] sm:$0xf0]  ;;  %v2574_v35 = vor.u32 %v3661_v22, %v2573_v21  ;;  %1665 = vmatpush.bf16.msra.mxu3 %v2846_v24 }
  0x2b   :  { %v2829_v26 = vld [vmem:[#allocation2 + $0x300] sm:$0xf]  ;;  %v3725_v27 = vld [vmem:[#allocation2 + $0x30c] sm:$0xf0]  ;;  %v2702_v36 = vor.u32 %v3693_v25, %v2701_v23  ;;  %1627 = vmatpush.bf16.msra.mxu0 %v2446_v31  ;;  %v4056_v25 = vpack.c.bf16 %v59_v19, %v59_v19 }
  0x2c   :  { %v3069_v28 = vld [vmem:[#allocation2 + $0x4e0] sm:$0xf]  ;;  %v3785_v29 = vld [vmem:[#allocation2 + $0x4ec] sm:$0xf0]  ;;  %v2830_v39 = vor.u32 %v3725_v27, %v2829_v26  ;;  %1640 = vmatpush.bf16.msra.mxu1 %v2574_v35 }
  0x2d   :  { %v3197_v30 = vld [vmem:[#allocation2 + $0x5e0] sm:$0xf]  ;;  %v3817_v32 = vld [vmem:[#allocation2 + $0x5ec] sm:$0xf0]  ;;  %v3070_v40 = vor.u32 %v3785_v29, %v3069_v28  ;;  %1653 = vmatpush.bf16.msra.mxu2 %v2702_v36 }
  0x2e   :  { %v3325_v33 = vld [vmem:[#allocation2 + $0x6e0] sm:$0xf]  ;;  %v3849_v34 = vld [vmem:[#allocation2 + $0x6ec] sm:$0xf0]  ;;  %v3198_v41 = vor.u32 %v3817_v32, %v3197_v30  ;;  %1666 = vmatpush.bf16.msra.mxu3 %v2830_v39 }
  0x2f   :  { %v3453_v37 = vld [vmem:[#allocation2 + $0x7e0] sm:$0xf]  ;;  %v3881_v38 = vld [vmem:[#allocation2 + $0x7ec] sm:$0xf0]  ;;  %v3326_v42 = vor.u32 %v3849_v34, %v3325_v33  ;;  %1672 = vmatpush.bf16.msrb.mxu0 %v3070_v40  ;;  %1641 = vmatmul.bf16.vlgmr.msra.gmra.mxu1 %v4056_v25 }
  0x30   :  { %v3053_v43 = vld [vmem:[#allocation2 + $0x4c0] sm:$0xf]  ;;  %v3781_v44 = vld [vmem:[#allocation2 + $0x4cc] sm:$0xf0]  ;;  %v3454_v46 = vor.u32 %v3881_v38, %v3453_v37  ;;  %1685 = vmatpush.bf16.msrb.mxu1 %v3198_v41 }
  0x31   :  { %v3181_v45 = vld [vmem:[#allocation2 + $0x5c0] sm:$0xf]  ;;  %v3813_v47 = vld [vmem:[#allocation2 + $0x5cc] sm:$0xf0]  ;;  %v3054_v52 = vor.u32 %v3781_v44, %v3053_v43  ;;  %1698 = vmatpush.bf16.msrb.mxu2 %v3326_v42  ;;  %1667 = vmatmul.bf16.vlgmr.msra.gmra.mxu3 %v4048_v15 }
  0x32   :  { %v3309_v48 = vld [vmem:[#allocation2 + $0x6c0] sm:$0xf]  ;;  %v3845_v49 = vld [vmem:[#allocation2 + $0x6cc] sm:$0xf0]  ;;  %v3182_v54 = vor.u32 %v3813_v47, %v3181_v45  ;;  %1711 = vmatpush.bf16.msrb.mxu3 %v3454_v46 }
  0x33   :  { %v3437_v50 = vld [vmem:[#allocation2 + $0x7c0] sm:$0xf]  ;;  %v3877_v51 = vld [vmem:[#allocation2 + $0x7cc] sm:$0xf0]  ;;  %v3310_v55 = vor.u32 %v3845_v49, %v3309_v48  ;;  %1673 = vmatpush.bf16.msrb.mxu0 %v3054_v52 }
  0x34   :  { %v3037_v53 = vld [vmem:[#allocation2 + $0x4a0] sm:$0xf]  ;;  %v3777_v56 = vld [vmem:[#allocation2 + $0x4ac] sm:$0xf0]  ;;  %v3438_v59 = vor.u32 %v3877_v51, %v3437_v50  ;;  %1686 = vmatpush.bf16.msrb.mxu1 %v3182_v54 }
  0x35   :  { %v3165_v57 = vld [vmem:[#allocation2 + $0x5a0] sm:$0xf]  ;;  %v3809_v58 = vld [vmem:[#allocation2 + $0x5ac] sm:$0xf0]  ;;  %v3038_v0 = vor.u32 %v3777_v56, %v3037_v53  ;;  %1699 = vmatpush.bf16.msrb.mxu2 %v3310_v55 }
  0x36   :  { %v3293_v60 = vld [vmem:[#allocation2 + $0x6a0] sm:$0xf]  ;;  %v3841_v61 = vld [vmem:[#allocation2 + $0x6ac] sm:$0xf0]  ;;  %v3166_v1 = vor.u32 %v3809_v58, %v3165_v57  ;;  %1712 = vmatpush.bf16.msrb.mxu3 %v3438_v59 }
  0x37   :  { %v3421_v62 = vld [vmem:[#allocation2 + $0x7a0] sm:$0xf]  ;;  %v3873_v63 = vld [vmem:[#allocation2 + $0x7ac] sm:$0xf0]  ;;  %v3294_v5 = vor.u32 %v3841_v61, %v3293_v60  ;;  %1674 = vmatpush.bf16.msrb.mxu0 %v3038_v0 }
  0x38   :  { %v3021_v2 = vld [vmem:[#allocation2 + $0x480] sm:$0xf]  ;;  %v60_v3 = vld [vmem:[%s4168_s0 + $0x10] sm:$0xff]  ;;  %v3422_v11 = vor.u32 %v3873_v63, %v3421_v62  ;;  %1687 = vmatpush.bf16.msrb.mxu1 %v3166_v1 }
  0x39   :  { %v58_v4 = vld [vmem:[%s4168_s0] sm:$0xff]  ;;  %v3773_v6 = vld [vmem:[#allocation2 + $0x48c] sm:$0xf0]  ;;  %v4041_v8 = vpack.c.bf16 %v60_v3, %v60_v3  ;;  %1700 = vmatpush.bf16.msrb.mxu2 %v3294_v5  ;;  %v2559_v5 = vld [vmem:[#allocation2 + $0xf0] sm:$0xf0] }
  0x3a   :  { %v3149_v7 = vld [vmem:[#allocation2 + $0x580] sm:$0xf]  ;;  %v4043_v9 = vpack.c.bf16 %v58_v4, %v58_v4  ;;  %v3805_v12 = vld [vmem:[#allocation2 + $0x58c] sm:$0xf0]  ;;  %v3022_v18 = vor.u32 %v3773_v6, %v3021_v2  ;;  %1713 = vmatpush.bf16.msrb.mxu3 %v3422_v11  ;;  %v3655_v4 = vld [vmem:[#allocation2 + $0xe4] sm:$0xf] }
  0x3b   :  { %v3277_v13 = vld [vmem:[#allocation2 + $0x680] sm:$0xf]  ;;  %v3837_v14 = vld [vmem:[#allocation2 + $0x68c] sm:$0xf0]  ;;  %1654 = vmatmul.bf16.vlgmr.msra.gmra.mxu2 %v4041_v8  ;;  %v3150_v20 = vor.u32 %v3805_v12, %v3149_v7  ;;  %v3687_v6 = vld [vmem:[#allocation2 + $0x1e4] sm:$0xf] }
  0x3c   :  { %v3405_v16 = vld [vmem:[#allocation2 + $0x780] sm:$0xf]  ;;  %v3869_v17 = vld [vmem:[#allocation2 + $0x78c] sm:$0xf0]  ;;  %1628 = vmatmul.bf16.vlgmr.msra.gmra.mxu0 %v4043_v9  ;;  %v3278_v21 = vor.u32 %v3837_v14, %v3277_v13  ;;  %v3719_v11 = vld [vmem:[#allocation2 + $0x2e4] sm:$0xf] }
  0x3d   :  { %v3005_v22 = vld [vmem:[#allocation2 + $0x460] sm:$0xf]  ;;  %v3769_v23 = vld [vmem:[#allocation2 + $0x46c] sm:$0xf0]  ;;  %v3406_v26 = vor.u32 %v3869_v17, %v3405_v16  ;;  %1675 = vmatpush.bf16.msrb.mxu0 %v3022_v18  ;;  %1688 = vmatpush.bf16.msrb.mxu1 %v3150_v20  ;;  %v2815_v12 = vld [vmem:[#allocation2 + $0x2f0] sm:$0xf0]  ;;  %v2562_v20 = vor.u32 %v3655_v4, %v2559_v5 }
  0x3e   :  { %v3133_v24 = vld [vmem:[#allocation2 + $0x560] sm:$0xf]  ;;  %v3801_v27 = vld [vmem:[#allocation2 + $0x56c] sm:$0xf0]  ;;  %v3006_v32 = vor.u32 %v3769_v23, %v3005_v22  ;;  %1701 = vmatpush.bf16.msrb.mxu2 %v3278_v21  ;;  %v3751_v16 = vld [vmem:[#allocation2 + $0x3e4] sm:$0xf] }
  0x3f   :  { %v3261_v28 = vld [vmem:[#allocation2 + $0x660] sm:$0xf]  ;;  %v3833_v29 = vld [vmem:[#allocation2 + $0x66c] sm:$0xf0]  ;;  %v3134_v33 = vor.u32 %v3801_v27, %v3133_v24  ;;  %1714 = vmatpush.bf16.msrb.mxu3 %v3406_v26  ;;  %v2943_v17 = vld [vmem:[#allocation2 + $0x3f0] sm:$0xf0]  ;;  %v2690_v24 = vor.u32 %v3687_v6, %v2687_v10  ;;  %v2818_v26 = vor.u32 %v3719_v11, %v2815_v12 }
  0x40   :  { %v3389_v30 = vld [vmem:[#allocation2 + $0x760] sm:$0xf]  ;;  %v3865_v31 = vld [vmem:[#allocation2 + $0x76c] sm:$0xf0]  ;;  %v3262_v34 = vor.u32 %v3833_v29, %v3261_v28  ;;  %v3651_v21 = vld [vmem:[#allocation2 + $0xc4] sm:$0xf] }
  0x41   :  { %v2989_v35 = vld [vmem:[#allocation2 + $0x440] sm:$0xf]  ;;  %v3765_v36 = vld [vmem:[#allocation2 + $0x44c] sm:$0xf0]  ;;  %v3390_v38 = vor.u32 %v3865_v31, %v3389_v30  ;;  %1676 = vmatpush.bf16.msrb.mxu0 %v3006_v32  ;;  %1689 = vmatpush.bf16.msrb.mxu1 %v3134_v33  ;;  %v65_v23 = vld [vmem:[%s4168_s0 + $0x38] sm:$0xff]  ;;  %v2946_v30 = vor.u32 %v3751_v16, %v2943_v17 }
  0x42   :  { %v3117_v37 = vld [vmem:[#allocation2 + $0x540] sm:$0xf]  ;;  %v3797_v39 = vld [vmem:[#allocation2 + $0x54c] sm:$0xf0]  ;;  %v2990_v44 = vor.u32 %v3765_v36, %v2989_v35  ;;  %1702 = vmatpush.bf16.msrb.mxu2 %v3262_v34  ;;  %v2543_v27 = vld [vmem:[#allocation2 + $0xd0] sm:$0xf0] }
  0x43   :  { %v3245_v40 = vld [vmem:[#allocation2 + $0x640] sm:$0xf]  ;;  %v3829_v41 = vld [vmem:[#allocation2 + $0x64c] sm:$0xf0]  ;;  %v3118_v45 = vor.u32 %v3797_v39, %v3117_v37  ;;  %1715 = vmatpush.bf16.msrb.mxu3 %v3390_v38  ;;  %v3683_v28 = vld [vmem:[#allocation2 + $0x1c4] sm:$0xf]  ;;  %v4075_v38 = vpack.c.bf16 %v65_v23, %v65_v23  ;;  %v2546_v39 = vor.u32 %v3651_v21, %v2543_v27 }
  0x44   :  { %v3373_v42 = vld [vmem:[#allocation2 + $0x740] sm:$0xf]  ;;  %v3861_v43 = vld [vmem:[#allocation2 + $0x74c] sm:$0xf0]  ;;  %v3246_v46 = vor.u32 %v3829_v41, %v3245_v40  ;;  %v63_v29 = vld [vmem:[%s4168_s0 + $0x28] sm:$0xff] }
  0x45   :  { %v2973_v47 = vld [vmem:[#allocation2 + $0x420] sm:$0xf]  ;;  %v3761_v48 = vld [vmem:[#allocation2 + $0x42c] sm:$0xf0]  ;;  %v3374_v50 = vor.u32 %v3861_v43, %v3373_v42  ;;  %1677 = vmatpush.bf16.msrb.mxu0 %v2990_v44  ;;  %1690 = vmatpush.bf16.msrb.mxu1 %v3118_v45  ;;  %v2671_v31 = vld [vmem:[#allocation2 + $0x1d0] sm:$0xf0]  ;;  %v4077_v40 = vpack.c.bf16 %v63_v29, %v63_v29 }
  0x46   :  { %v3101_v49 = vld [vmem:[#allocation2 + $0x520] sm:$0xf]  ;;  %v3793_v51 = vld [vmem:[#allocation2 + $0x52c] sm:$0xf0]  ;;  %v2974_v56 = vor.u32 %v3761_v48, %v2973_v47  ;;  %1703 = vmatpush.bf16.msrb.mxu2 %v3246_v46  ;;  %v3715_v32 = vld [vmem:[#allocation2 + $0x2c4] sm:$0xf]  ;;  %v2674_v41 = vor.u32 %v3683_v28, %v2671_v31 }
  0x47   :  { %v3229_v52 = vld [vmem:[#allocation2 + $0x620] sm:$0xf]  ;;  %v3825_v53 = vld [vmem:[#allocation2 + $0x62c] sm:$0xf0]  ;;  %v3102_v59 = vor.u32 %v3793_v51, %v3101_v49  ;;  %1716 = vmatpush.bf16.msrb.mxu3 %v3374_v50  ;;  %v2799_v33 = vld [vmem:[#allocation2 + $0x2d0] sm:$0xf0] }
  0x48   :  { %v3357_v54 = vld [vmem:[#allocation2 + $0x720] sm:$0xf]  ;;  %v3857_v55 = vld [vmem:[#allocation2 + $0x72c] sm:$0xf0]  ;;  %v3230_v60 = vor.u32 %v3825_v53, %v3229_v52  ;;  %v3747_v35 = vld [vmem:[#allocation2 + $0x3c4] sm:$0xf]  ;;  %v2802_v42 = vor.u32 %v3715_v32, %v2799_v33 }
  0x49   :  { %v2957_v57 = vld [vmem:[#allocation2 + $0x400] sm:$0xf]  ;;  %v3757_v58 = vld [vmem:[#allocation2 + $0x40c] sm:$0xf0]  ;;  %v3358_v0 = vor.u32 %v3857_v55, %v3357_v54  ;;  %1678 = vmatpush.bf16.msrb.mxu0 %v2974_v56  ;;  %1691 = vmatpush.bf16.msrb.mxu1 %v3102_v59  ;;  %v2927_v36 = vld [vmem:[#allocation2 + $0x3d0] sm:$0xf0] }
  0x4a   :  { %v3085_v61 = vld [vmem:[#allocation2 + $0x500] sm:$0xf]  ;;  %v3789_v62 = vld [vmem:[#allocation2 + $0x50c] sm:$0xf0]  ;;  %v2958_v7 = vor.u32 %v3757_v58, %v2957_v57  ;;  %1704 = vmatpush.bf16.msrb.mxu2 %v3230_v60  ;;  %v3647_v43 = vld [vmem:[#allocation2 + $0xa4] sm:$0xf]  ;;  %v2930_v46 = vor.u32 %v3747_v35, %v2927_v36 }
  0x4b   :  { %v3213_v63 = vld [vmem:[#allocation2 + $0x600] sm:$0xf]  ;;  %v3821_v1 = vld [vmem:[#allocation2 + $0x60c] sm:$0xf0]  ;;  %v3086_v13 = vor.u32 %v3789_v62, %v3085_v61  ;;  %1717 = vmatpush.bf16.msrb.mxu3 %v3358_v0  ;;  %v2527_v44 = vld [vmem:[#allocation2 + $0xb0] sm:$0xf0] }
  0x4c   :  { %v3341_v2 = vld [vmem:[#allocation2 + $0x700] sm:$0xf]  ;;  %v3853_v3 = vld [vmem:[#allocation2 + $0x70c] sm:$0xf0]  ;;  %v3214_v14 = vor.u32 %v3821_v1, %v3213_v63  ;;  %v3679_v45 = vld [vmem:[#allocation2 + $0x1a4] sm:$0xf]  ;;  %v2530_v52 = vor.u32 %v3647_v43, %v2527_v44 }
  0x4d   :  { %v64_v18 = vld [vmem:[%s4168_s0 + $0x30] sm:$0xff]  ;;  %v3342_v19 = vor.u32 %v3853_v3, %v3341_v2  ;;  %v62_v22 = vld [vmem:[%s4168_s0 + $0x20] sm:$0xff]  ;;  %1679 = vmatpush.bf16.msrb.mxu0 %v2958_v7  ;;  %1692 = vmatpush.bf16.msrb.mxu1 %v3086_v13 }
  0x4e   :  { %v4071_v34 = vpack.c.bf16 %v64_v18, %v64_v18  ;;  %1705 = vmatpush.bf16.msrb.mxu2 %v3214_v14  ;;  %v4073_v37 = vpack.c.bf16 %v62_v22, %v62_v22  ;;  %v2655_v47 = vld [vmem:[#allocation2 + $0x1b0] sm:$0xf0]  ;;  %v3711_v48 = vld [vmem:[#allocation2 + $0x2a4] sm:$0xf] }
  0x4f   :  { %1718 = vmatpush.bf16.msrb.mxu3 %v3342_v19  ;;  %v2783_v49 = vld [vmem:[#allocation2 + $0x2b0] sm:$0xf0]  ;;  %v3743_v50 = vld [vmem:[#allocation2 + $0x3a4] sm:$0xf]  ;;  %v2658_v53 = vor.u32 %v3679_v45, %v2655_v47 }
  0x50   :  { %v2911_v51 = vld [vmem:[#allocation2 + $0x3b0] sm:$0xf0]  ;;  %1680 = vmatmul.bf16.vlgmr.msrb.gmra.mxu0 %v4073_v37  ;;  %1693 = vmatmul.bf16.vlgmr.msrb.gmra.mxu1 %v4077_v40  ;;  %v2786_v54 = vor.u32 %v3711_v48, %v2783_v49  ;;  %v3643_v55 = vld [vmem:[#allocation2 + $0x84] sm:$0xf] }
  0x51   :  { %1724 = vmatpush.bf16.msra.mxu0 %v2562_v20  ;;  %1737 = vmatpush.bf16.msra.mxu1 %v2690_v24  ;;  %v2511_v56 = vld [vmem:[#allocation2 + $0x90] sm:$0xf0]  ;;  %v3675_v57 = vld [vmem:[#allocation2 + $0x184] sm:$0xf]  ;;  %v2914_v58 = vor.u32 %v3743_v50, %v2911_v51 }
  0x52   :  { %1750 = vmatpush.bf16.msra.mxu2 %v2818_v26  ;;  %1719 = vmatmul.bf16.vlgmr.msrb.gmra.mxu3 %v4075_v38  ;;  %v2639_v59 = vld [vmem:[#allocation2 + $0x190] sm:$0xf0]  ;;  %v3707_v60 = vld [vmem:[#allocation2 + $0x284] sm:$0xf]  ;;  %v2514_v0 = vor.u32 %v3643_v55, %v2511_v56 }
  0x53   :  { %1763 = vmatpush.bf16.msra.mxu3 %v2946_v30  ;;  %1706 = vmatmul.bf16.vlgmr.msrb.gmra.mxu2 %v4071_v34  ;;  %v2767_v61 = vld [vmem:[#allocation2 + $0x290] sm:$0xf0]  ;;  %v3739_v62 = vld [vmem:[#allocation2 + $0x384] sm:$0xf]  ;;  %v2642_v1 = vor.u32 %v3675_v57, %v2639_v59 }
  0x54   :  { %v2895_v63 = vld [vmem:[#allocation2 + $0x390] sm:$0xf0]  ;;  %v2770_v2 = vor.u32 %v3707_v60, %v2767_v61  ;;  %v3639_v3 = vld [vmem:[#allocation2 + $0x64] sm:$0xf] }
  0x55   :  { %1725 = vmatpush.bf16.msra.mxu0 %v2546_v39  ;;  %1738 = vmatpush.bf16.msra.mxu1 %v2674_v41  ;;  %v2495_v4 = vld [vmem:[#allocation2 + $0x70] sm:$0xf0]  ;;  %v3671_v5 = vld [vmem:[#allocation2 + $0x164] sm:$0xf]  ;;  %v2898_v6 = vor.u32 %v3739_v62, %v2895_v63 }
  0x56   :  { %1751 = vmatpush.bf16.msra.mxu2 %v2802_v42  ;;  %v2623_v7 = vld [vmem:[#allocation2 + $0x170] sm:$0xf0]  ;;  %v3703_v10 = vld [vmem:[#allocation2 + $0x264] sm:$0xf]  ;;  %v2498_v14 = vor.u32 %v3639_v3, %v2495_v4 }
  0x57   :  { %1764 = vmatpush.bf16.msra.mxu3 %v2930_v46  ;;  %v2751_v11 = vld [vmem:[#allocation2 + $0x270] sm:$0xf0]  ;;  %v3735_v12 = vld [vmem:[#allocation2 + $0x364] sm:$0xf]  ;;  %v2626_v16 = vor.u32 %v3671_v5, %v2623_v7 }
  0x58   :  { %v2879_v13 = vld [vmem:[#allocation2 + $0x370] sm:$0xf0]  ;;  %v2754_v17 = vor.u32 %v3703_v10, %v2751_v11  ;;  %v3635_v18 = vld [vmem:[#allocation2 + $0x44] sm:$0xf] }
  0x59   :  { %1726 = vmatpush.bf16.msra.mxu0 %v2530_v52  ;;  %1739 = vmatpush.bf16.msra.mxu1 %v2658_v53  ;;  %v2479_v19 = vld [vmem:[#allocation2 + $0x50] sm:$0xf0]  ;;  %v3667_v20 = vld [vmem:[#allocation2 + $0x144] sm:$0xf]  ;;  %v2882_v21 = vor.u32 %v3735_v12, %v2879_v13 }
  0x5a   :  { %1752 = vmatpush.bf16.msra.mxu2 %v2786_v54  ;;  %v2607_v22 = vld [vmem:[#allocation2 + $0x150] sm:$0xf0]  ;;  %v3699_v23 = vld [vmem:[#allocation2 + $0x244] sm:$0xf]  ;;  %v2482_v28 = vor.u32 %v3635_v18, %v2479_v19 }
  0x5b   :  { %1765 = vmatpush.bf16.msra.mxu3 %v2914_v58  ;;  %v2735_v24 = vld [vmem:[#allocation2 + $0x250] sm:$0xf0]  ;;  %v3731_v26 = vld [vmem:[#allocation2 + $0x344] sm:$0xf]  ;;  %v2610_v29 = vor.u32 %v3667_v20, %v2607_v22 }
  0x5c   :  { %v2863_v27 = vld [vmem:[#allocation2 + $0x350] sm:$0xf0]  ;;  %v2738_v30 = vor.u32 %v3699_v23, %v2735_v24  ;;  %v3631_v31 = vld [vmem:[#allocation2 + $0x24] sm:$0xf] }
  0x5d   :  { %1727 = vmatpush.bf16.msra.mxu0 %v2514_v0  ;;  %1740 = vmatpush.bf16.msra.mxu1 %v2642_v1  ;;  %v2463_v32 = vld [vmem:[#allocation2 + $0x30] sm:$0xf0]  ;;  %v3663_v33 = vld [vmem:[#allocation2 + $0x124] sm:$0xf]  ;;  %v2866_v35 = vor.u32 %v3731_v26, %v2863_v27 }
  0x5e   :  { %1753 = vmatpush.bf16.msra.mxu2 %v2770_v2  ;;  %v2591_v36 = vld [vmem:[#allocation2 + $0x130] sm:$0xf0]  ;;  %v3695_v39 = vld [vmem:[#allocation2 + $0x224] sm:$0xf]  ;;  %v2466_v44 = vor.u32 %v3631_v31, %v2463_v32 }
  0x5f   :  { %1766 = vmatpush.bf16.msra.mxu3 %v2898_v6  ;;  %v2719_v41 = vld [vmem:[#allocation2 + $0x230] sm:$0xf0]  ;;  %v3727_v42 = vld [vmem:[#allocation2 + $0x324] sm:$0xf]  ;;  %v2594_v47 = vor.u32 %v3663_v33, %v2591_v36 }
  0x60   :  { %v2847_v43 = vld [vmem:[#allocation2 + $0x330] sm:$0xf0]  ;;  %v3627_v45 = vld [vmem:[#allocation2 + $0x4] sm:$0xf]  ;;  %v2722_v48 = vor.u32 %v3695_v39, %v2719_v41 }
  0x61   :  { %1728 = vmatpush.bf16.msra.mxu0 %v2498_v14  ;;  %1741 = vmatpush.bf16.msra.mxu1 %v2626_v16  ;;  %v2447_v46 = vld [vmem:[#allocation2 + $0x10] sm:$0xf0]  ;;  %v3659_v49 = vld [vmem:[#allocation2 + $0x104] sm:$0xf]  ;;  %v2850_v52 = vor.u32 %v3727_v42, %v2847_v43 }
  0x62   :  { %1754 = vmatpush.bf16.msra.mxu2 %v2754_v17  ;;  %v2575_v50 = vld [vmem:[#allocation2 + $0x110] sm:$0xf0]  ;;  %v3691_v51 = vld [vmem:[#allocation2 + $0x204] sm:$0xf]  ;;  %v2450_v59 = vor.u32 %v3627_v45, %v2447_v46 }
  0x63   :  { %1767 = vmatpush.bf16.msra.mxu3 %v2882_v21  ;;  %v2703_v53 = vld [vmem:[#allocation2 + $0x210] sm:$0xf0]  ;;  %v3723_v54 = vld [vmem:[#allocation2 + $0x304] sm:$0xf]  ;;  %v2578_v63 = vor.u32 %v3659_v49, %v2575_v50 }
  0x64   :  { %v2831_v55 = vld [vmem:[#allocation2 + $0x310] sm:$0xf0]  ;;  %v3783_v56 = vld [vmem:[#allocation2 + $0x4e4] sm:$0xf]  ;;  %v2706_v0 = vor.u32 %v3691_v51, %v2703_v53 }
  0x65   :  { %1729 = vmatpush.bf16.msra.mxu0 %v2482_v28  ;;  %1742 = vmatpush.bf16.msra.mxu1 %v2610_v29  ;;  %v3071_v57 = vld [vmem:[#allocation2 + $0x4f0] sm:$0xf0]  ;;  %v3815_v58 = vld [vmem:[#allocation2 + $0x5e4] sm:$0xf]  ;;  %v2834_v3 = vor.u32 %v3723_v54, %v2831_v55 }
  0x66   :  { %1755 = vmatpush.bf16.msra.mxu2 %v2738_v30  ;;  %v3199_v60 = vld [vmem:[#allocation2 + $0x5f0] sm:$0xf0]  ;;  %v3847_v61 = vld [vmem:[#allocation2 + $0x6e4] sm:$0xf]  ;;  %v3074_v4 = vor.u32 %v3783_v56, %v3071_v57 }
  0x67   :  { %1768 = vmatpush.bf16.msra.mxu3 %v2866_v35  ;;  %v3327_v62 = vld [vmem:[#allocation2 + $0x6f0] sm:$0xf0]  ;;  %v3879_v1 = vld [vmem:[#allocation2 + $0x7e4] sm:$0xf]  ;;  %v3202_v5 = vor.u32 %v3815_v58, %v3199_v60 }
  0x68   :  { %v3455_v2 = vld [vmem:[#allocation2 + $0x7f0] sm:$0xf0]  ;;  %v3330_v6 = vor.u32 %v3847_v61, %v3327_v62  ;;  %v3779_v7 = vld [vmem:[#allocation2 + $0x4c4] sm:$0xf] }
  0x69   :  { %1730 = vmatpush.bf16.msra.mxu0 %v2466_v44  ;;  %1743 = vmatpush.bf16.msra.mxu1 %v2594_v47  ;;  %v3055_v10 = vld [vmem:[#allocation2 + $0x4d0] sm:$0xf0]  ;;  %v3811_v11 = vld [vmem:[#allocation2 + $0x5c4] sm:$0xf]  ;;  %v3458_v12 = vor.u32 %v3879_v1, %v3455_v2 }
  0x6a   :  { %1756 = vmatpush.bf16.msra.mxu2 %v2722_v48  ;;  %v3183_v13 = vld [vmem:[#allocation2 + $0x5d0] sm:$0xf0]  ;;  %v3843_v14 = vld [vmem:[#allocation2 + $0x6c4] sm:$0xf]  ;;  %v3058_v19 = vor.u32 %v3779_v7, %v3055_v10 }
  0x6b   :  { %1769 = vmatpush.bf16.msra.mxu3 %v2850_v52  ;;  %v3311_v16 = vld [vmem:[#allocation2 + $0x6d0] sm:$0xf0]  ;;  %v3875_v17 = vld [vmem:[#allocation2 + $0x7c4] sm:$0xf]  ;;  %v3186_v20 = vor.u32 %v3811_v11, %v3183_v13 }
  0x6c   :  { %v3439_v18 = vld [vmem:[#allocation2 + $0x7d0] sm:$0xf0]  ;;  %v3314_v21 = vor.u32 %v3843_v14, %v3311_v16  ;;  %v3775_v22 = vld [vmem:[#allocation2 + $0x4a4] sm:$0xf] }
  0x6d   :  { %1731 = vmatpush.bf16.msra.mxu0 %v2450_v59  ;;  %1744 = vmatpush.bf16.msra.mxu1 %v2578_v63  ;;  %v3039_v23 = vld [vmem:[#allocation2 + $0x4b0] sm:$0xf0]  ;;  %v3807_v24 = vld [vmem:[#allocation2 + $0x5a4] sm:$0xf]  ;;  %v3442_v26 = vor.u32 %v3875_v17, %v3439_v18 }
  0x6e   :  { %1757 = vmatpush.bf16.msra.mxu2 %v2706_v0  ;;  %v3167_v27 = vld [vmem:[#allocation2 + $0x5b0] sm:$0xf0]  ;;  %v3839_v28 = vld [vmem:[#allocation2 + $0x6a4] sm:$0xf]  ;;  %v3042_v32 = vor.u32 %v3775_v22, %v3039_v23 }
  0x6f   :  { %1770 = vmatpush.bf16.msra.mxu3 %v2834_v3  ;;  %v3295_v29 = vld [vmem:[#allocation2 + $0x6b0] sm:$0xf0]  ;;  %v3871_v30 = vld [vmem:[#allocation2 + $0x7a4] sm:$0xf]  ;;  %v3170_v33 = vor.u32 %v3807_v24, %v3167_v27 }
  0x70   :  { %v3423_v31 = vld [vmem:[#allocation2 + $0x7b0] sm:$0xf0]  ;;  %1732 = vmatmul.bf16.vlgmr.msra.gmra.mxu0 %v4043_v9  ;;  %1745 = vmatmul.bf16.vlgmr.msra.gmra.mxu1 %v4056_v25  ;;  %v3298_v35 = vor.u32 %v3839_v28, %v3295_v29  ;;  %v3771_v36 = vld [vmem:[#allocation2 + $0x484] sm:$0xf] }
  0x71   :  { %1776 = vmatpush.bf16.msrb.mxu0 %v3074_v4  ;;  %1789 = vmatpush.bf16.msrb.mxu1 %v3202_v5  ;;  %v3023_v39 = vld [vmem:[#allocation2 + $0x490] sm:$0xf0]  ;;  %v3803_v41 = vld [vmem:[#allocation2 + $0x584] sm:$0xf]  ;;  %v3426_v42 = vor.u32 %v3871_v30, %v3423_v31 }
  0x72   :  { %1802 = vmatpush.bf16.msrb.mxu2 %v3330_v6  ;;  %1771 = vmatmul.bf16.vlgmr.msra.gmra.mxu3 %v4048_v15  ;;  %v3151_v43 = vld [vmem:[#allocation2 + $0x590] sm:$0xf0]  ;;  %v3835_v44 = vld [vmem:[#allocation2 + $0x684] sm:$0xf]  ;;  %v3026_v48 = vor.u32 %v3771_v36, %v3023_v39  ;;  %v2565_v39 = vld [vmem:[#allocation2 + $0xe8] sm:$0xf] }
  0x73   :  { %1815 = vmatpush.bf16.msrb.mxu3 %v3458_v12  ;;  %1758 = vmatmul.bf16.vlgmr.msra.gmra.mxu2 %v4041_v8  ;;  %v3279_v45 = vld [vmem:[#allocation2 + $0x690] sm:$0xf0]  ;;  %v3867_v46 = vld [vmem:[#allocation2 + $0x784] sm:$0xf]  ;;  %v3154_v49 = vor.u32 %v3803_v41, %v3151_v43  ;;  %v3658_v41 = vld [vmem:[#allocation2 + $0xf4] sm:$0xf0] }
  0x74   :  { %v3407_v47 = vld [vmem:[#allocation2 + $0x790] sm:$0xf0]  ;;  %v3282_v50 = vor.u32 %v3835_v44, %v3279_v45  ;;  %v3767_v51 = vld [vmem:[#allocation2 + $0x464] sm:$0xf]  ;;  %v3690_v44 = vld [vmem:[#allocation2 + $0x1f4] sm:$0xf0] }
  0x75   :  { %1777 = vmatpush.bf16.msrb.mxu0 %v3058_v19  ;;  %1790 = vmatpush.bf16.msrb.mxu1 %v3186_v20  ;;  %v3007_v52 = vld [vmem:[#allocation2 + $0x470] sm:$0xf0]  ;;  %v3799_v53 = vld [vmem:[#allocation2 + $0x564] sm:$0xf]  ;;  %v3410_v54 = vor.u32 %v3867_v46, %v3407_v47  ;;  %v2821_v45 = vld [vmem:[#allocation2 + $0x2e8] sm:$0xf] }
  0x76   :  { %1803 = vmatpush.bf16.msrb.mxu2 %v3314_v21  ;;  %v3135_v55 = vld [vmem:[#allocation2 + $0x570] sm:$0xf0]  ;;  %v3831_v56 = vld [vmem:[#allocation2 + $0x664] sm:$0xf]  ;;  %v3010_v60 = vor.u32 %v3767_v51, %v3007_v52  ;;  %v3722_v46 = vld [vmem:[#allocation2 + $0x2f4] sm:$0xf0]  ;;  %v2566_v52 = vor.u32 %v3658_v41, %v2565_v39 }
  0x77   :  { %1816 = vmatpush.bf16.msrb.mxu3 %v3442_v26  ;;  %v3263_v57 = vld [vmem:[#allocation2 + $0x670] sm:$0xf0]  ;;  %v3863_v58 = vld [vmem:[#allocation2 + $0x764] sm:$0xf]  ;;  %v3138_v61 = vor.u32 %v3799_v53, %v3135_v55  ;;  %v2549_v55 = vld [vmem:[#allocation2 + $0xc8] sm:$0xf] }
  0x78   :  { %v3391_v59 = vld [vmem:[#allocation2 + $0x770] sm:$0xf0]  ;;  %v3266_v62 = vor.u32 %v3831_v56, %v3263_v57  ;;  %v3763_v63 = vld [vmem:[#allocation2 + $0x444] sm:$0xf]  ;;  %v3654_v56 = vld [vmem:[#allocation2 + $0xd4] sm:$0xf0] }
  0x79   :  { %1778 = vmatpush.bf16.msrb.mxu0 %v3042_v32  ;;  %1791 = vmatpush.bf16.msrb.mxu1 %v3170_v33  ;;  %v2991_v0 = vld [vmem:[#allocation2 + $0x450] sm:$0xf0]  ;;  %v3795_v1 = vld [vmem:[#allocation2 + $0x544] sm:$0xf]  ;;  %v3394_v2 = vor.u32 %v3863_v58, %v3391_v59  ;;  %v2677_v57 = vld [vmem:[#allocation2 + $0x1c8] sm:$0xf] }
  0x7a   :  { %1804 = vmatpush.bf16.msrb.mxu2 %v3298_v35  ;;  %v3119_v3 = vld [vmem:[#allocation2 + $0x550] sm:$0xf0]  ;;  %v3827_v4 = vld [vmem:[#allocation2 + $0x644] sm:$0xf]  ;;  %v2994_v10 = vor.u32 %v3763_v63, %v2991_v0  ;;  %v3686_v59 = vld [vmem:[#allocation2 + $0x1d4] sm:$0xf0]  ;;  %v2550_v0 = vor.u32 %v3654_v56, %v2549_v55 }
  0x7b   :  { %1817 = vmatpush.bf16.msrb.mxu3 %v3426_v42  ;;  %v3247_v5 = vld [vmem:[#allocation2 + $0x650] sm:$0xf0]  ;;  %v3859_v6 = vld [vmem:[#allocation2 + $0x744] sm:$0xf]  ;;  %v3122_v11 = vor.u32 %v3795_v1, %v3119_v3  ;;  %v2693_v42 = vld [vmem:[#allocation2 + $0x1e8] sm:$0xf]  ;;  %v2678_v1 = vor.u32 %v3686_v59, %v2677_v57 }
  0x7c   :  { %v3375_v7 = vld [vmem:[#allocation2 + $0x750] sm:$0xf0]  ;;  %v3250_v12 = vor.u32 %v3827_v4, %v3247_v5  ;;  %v3759_v13 = vld [vmem:[#allocation2 + $0x424] sm:$0xf]  ;;  %v2694_v53 = vor.u32 %v3690_v44, %v2693_v42  ;;  %v3750_v63 = vld [vmem:[#allocation2 + $0x3d4] sm:$0xf0] }
  0x7d   :  { %1779 = vmatpush.bf16.msrb.mxu0 %v3026_v48  ;;  %1792 = vmatpush.bf16.msrb.mxu1 %v3154_v49  ;;  %v2975_v14 = vld [vmem:[#allocation2 + $0x430] sm:$0xf0]  ;;  %v3791_v16 = vld [vmem:[#allocation2 + $0x524] sm:$0xf]  ;;  %v3378_v17 = vor.u32 %v3859_v6, %v3375_v7  ;;  %v2949_v49 = vld [vmem:[#allocation2 + $0x3e8] sm:$0xf] }
  0x7e   :  { %1805 = vmatpush.bf16.msrb.mxu2 %v3282_v50  ;;  %v3103_v18 = vld [vmem:[#allocation2 + $0x530] sm:$0xf0]  ;;  %v3823_v19 = vld [vmem:[#allocation2 + $0x624] sm:$0xf]  ;;  %v2978_v23 = vor.u32 %v3759_v13, %v2975_v14  ;;  %v3754_v50 = vld [vmem:[#allocation2 + $0x3f4] sm:$0xf0] }
  0x7f   :  { %1818 = vmatpush.bf16.msrb.mxu3 %v3410_v54  ;;  %v3231_v20 = vld [vmem:[#allocation2 + $0x630] sm:$0xf0]  ;;  %v3855_v21 = vld [vmem:[#allocation2 + $0x724] sm:$0xf]  ;;  %v3106_v27 = vor.u32 %v3791_v16, %v3103_v18  ;;  %v2822_v54 = vor.u32 %v3722_v46, %v2821_v45  ;;  %v2950_v58 = vor.u32 %v3754_v50, %v2949_v49  ;;  %v2533_v3 = vld [vmem:[#allocation2 + $0xa8] sm:$0xf] }
  0x80   :  { %v3359_v22 = vld [vmem:[#allocation2 + $0x730] sm:$0xf0]  ;;  %v3755_v24 = vld [vmem:[#allocation2 + $0x404] sm:$0xf]  ;;  %v3234_v28 = vor.u32 %v3823_v19, %v3231_v20  ;;  %v3650_v4 = vld [vmem:[#allocation2 + $0xb4] sm:$0xf0] }
  0x81   :  { %1780 = vmatpush.bf16.msrb.mxu0 %v3010_v60  ;;  %1793 = vmatpush.bf16.msrb.mxu1 %v3138_v61  ;;  %v2959_v26 = vld [vmem:[#allocation2 + $0x410] sm:$0xf0]  ;;  %v3787_v29 = vld [vmem:[#allocation2 + $0x504] sm:$0xf]  ;;  %v3362_v32 = vor.u32 %v3855_v21, %v3359_v22  ;;  %v2805_v60 = vld [vmem:[#allocation2 + $0x2c8] sm:$0xf]  ;;  %v2534_v14 = vor.u32 %v3650_v4, %v2533_v3 }
  0x82   :  { %1806 = vmatpush.bf16.msrb.mxu2 %v3266_v62  ;;  %v3087_v30 = vld [vmem:[#allocation2 + $0x510] sm:$0xf0]  ;;  %v3819_v31 = vld [vmem:[#allocation2 + $0x604] sm:$0xf]  ;;  %v2962_v43 = vor.u32 %v3755_v24, %v2959_v26  ;;  %v3718_v61 = vld [vmem:[#allocation2 + $0x2d4] sm:$0xf0] }
  0x83   :  { %1819 = vmatpush.bf16.msrb.mxu3 %v3394_v2  ;;  %v3215_v33 = vld [vmem:[#allocation2 + $0x610] sm:$0xf0]  ;;  %v3851_v35 = vld [vmem:[#allocation2 + $0x704] sm:$0xf]  ;;  %v3090_v47 = vor.u32 %v3787_v29, %v3087_v30  ;;  %v2933_v62 = vld [vmem:[#allocation2 + $0x3c8] sm:$0xf]  ;;  %v2806_v2 = vor.u32 %v3718_v61, %v2805_v60 }
  0x84   :  { %v3343_v36 = vld [vmem:[#allocation2 + $0x710] sm:$0xf0]  ;;  %v3218_v48 = vor.u32 %v3819_v31, %v3215_v33  ;;  %v2661_v5 = vld [vmem:[#allocation2 + $0x1a8] sm:$0xf]  ;;  %v2934_v6 = vor.u32 %v3750_v63, %v2933_v62  ;;  %v3682_v7 = vld [vmem:[#allocation2 + $0x1b4] sm:$0xf0] }
  0x85   :  { %1781 = vmatpush.bf16.msrb.mxu0 %v2994_v10  ;;  %1794 = vmatpush.bf16.msrb.mxu1 %v3122_v11  ;;  %v3346_v51 = vor.u32 %v3851_v35, %v3343_v36  ;;  %v2789_v10 = vld [vmem:[#allocation2 + $0x2a8] sm:$0xf]  ;;  %v3714_v11 = vld [vmem:[#allocation2 + $0x2b4] sm:$0xf0]  ;;  %v2662_v16 = vor.u32 %v3682_v7, %v2661_v5 }
  0x86   :  { %1807 = vmatpush.bf16.msrb.mxu2 %v3250_v12  ;;  %v2917_v12 = vld [vmem:[#allocation2 + $0x3a8] sm:$0xf]  ;;  %v3746_v13 = vld [vmem:[#allocation2 + $0x3b4] sm:$0xf0] }
  0x87   :  { %1820 = vmatpush.bf16.msrb.mxu3 %v3378_v17  ;;  %v2790_v17 = vor.u32 %v3714_v11, %v2789_v10  ;;  %v2517_v18 = vld [vmem:[#allocation2 + $0x88] sm:$0xf]  ;;  %v3646_v19 = vld [vmem:[#allocation2 + $0x94] sm:$0xf0]  ;;  %v2918_v21 = vor.u32 %v3746_v13, %v2917_v12 }
  0x88   :  { %v2645_v20 = vld [vmem:[#allocation2 + $0x188] sm:$0xf]  ;;  %v3678_v22 = vld [vmem:[#allocation2 + $0x194] sm:$0xf0] }
  0x89   :  { %1782 = vmatpush.bf16.msrb.mxu0 %v2978_v23  ;;  %1795 = vmatpush.bf16.msrb.mxu1 %v3106_v27  ;;  %v2773_v23 = vld [vmem:[#allocation2 + $0x288] sm:$0xf]  ;;  %v3710_v24 = vld [vmem:[#allocation2 + $0x294] sm:$0xf0]  ;;  %v2646_v29 = vor.u32 %v3678_v22, %v2645_v20 }
  0x8a   :  { %1808 = vmatpush.bf16.msrb.mxu2 %v3234_v28  ;;  %v2901_v26 = vld [vmem:[#allocation2 + $0x388] sm:$0xf]  ;;  %v3742_v27 = vld [vmem:[#allocation2 + $0x394] sm:$0xf0]  ;;  %v2518_v28 = vor.u32 %v3646_v19, %v2517_v18  ;;  %v2774_v30 = vor.u32 %v3710_v24, %v2773_v23 }
  0x8b   :  { %1821 = vmatpush.bf16.msrb.mxu3 %v3362_v32  ;;  %v2501_v31 = vld [vmem:[#allocation2 + $0x68] sm:$0xf]  ;;  %v3642_v32 = vld [vmem:[#allocation2 + $0x74] sm:$0xf0]  ;;  %v2902_v35 = vor.u32 %v3742_v27, %v2901_v26 }
  0x8c   :  { %v2629_v33 = vld [vmem:[#allocation2 + $0x168] sm:$0xf]  ;;  %v3674_v36 = vld [vmem:[#allocation2 + $0x174] sm:$0xf0]  ;;  %v2502_v44 = vor.u32 %v3642_v32, %v2501_v31 }
  0x8d   :  { %1783 = vmatpush.bf16.msrb.mxu0 %v2962_v43  ;;  %1796 = vmatpush.bf16.msrb.mxu1 %v3090_v47  ;;  %v2757_v39 = vld [vmem:[#allocation2 + $0x268] sm:$0xf]  ;;  %v3706_v41 = vld [vmem:[#allocation2 + $0x274] sm:$0xf0]  ;;  %v2630_v45 = vor.u32 %v3674_v36, %v2629_v33 }
  0x8e   :  { %1809 = vmatpush.bf16.msrb.mxu2 %v3218_v48  ;;  %v2885_v42 = vld [vmem:[#allocation2 + $0x368] sm:$0xf]  ;;  %v3738_v43 = vld [vmem:[#allocation2 + $0x374] sm:$0xf0]  ;;  %v2758_v46 = vor.u32 %v3706_v41, %v2757_v39 }
  0x8f   :  { %1822 = vmatpush.bf16.msrb.mxu3 %v3346_v51  ;;  %v2485_v47 = vld [vmem:[#allocation2 + $0x48] sm:$0xf]  ;;  %v3638_v48 = vld [vmem:[#allocation2 + $0x54] sm:$0xf0]  ;;  %v2886_v50 = vor.u32 %v3738_v43, %v2885_v42 }
  0x90   :  { %1784 = vmatmul.bf16.vlgmr.msrb.gmra.mxu0 %v4073_v37  ;;  %1797 = vmatmul.bf16.vlgmr.msrb.gmra.mxu1 %v4077_v40  ;;  %v2613_v49 = vld [vmem:[#allocation2 + $0x148] sm:$0xf]  ;;  %v3670_v51 = vld [vmem:[#allocation2 + $0x154] sm:$0xf0]  ;;  %v2486_v56 = vor.u32 %v3638_v48, %v2485_v47 }
  0x91   :  { %1828 = vmatpush.bf16.msra.mxu0 %v2566_v52  ;;  %1841 = vmatpush.bf16.msra.mxu1 %v2694_v53  ;;  %v2741_v52 = vld [vmem:[#allocation2 + $0x248] sm:$0xf]  ;;  %v3702_v53 = vld [vmem:[#allocation2 + $0x254] sm:$0xf0]  ;;  %v2614_v57 = vor.u32 %v3670_v51, %v2613_v49 }
  0x92   :  { %1854 = vmatpush.bf16.msra.mxu2 %v2822_v54  ;;  %1823 = vmatmul.bf16.vlgmr.msrb.gmra.mxu3 %v4075_v38  ;;  %v2869_v54 = vld [vmem:[#allocation2 + $0x348] sm:$0xf]  ;;  %v3734_v55 = vld [vmem:[#allocation2 + $0x354] sm:$0xf0] }
  0x93   :  { %1867 = vmatpush.bf16.msra.mxu3 %v2950_v58  ;;  %1810 = vmatmul.bf16.vlgmr.msrb.gmra.mxu2 %v4071_v34  ;;  %v2742_v58 = vor.u32 %v3702_v53, %v2741_v52  ;;  %v2469_v59 = vld [vmem:[#allocation2 + $0x28] sm:$0xf]  ;;  %v3634_v60 = vld [vmem:[#allocation2 + $0x34] sm:$0xf0]  ;;  %v2870_v62 = vor.u32 %v3734_v55, %v2869_v54 }
  0x94   :  { %v2597_v61 = vld [vmem:[#allocation2 + $0x128] sm:$0xf]  ;;  %v3666_v63 = vld [vmem:[#allocation2 + $0x134] sm:$0xf0]  ;;  %v2470_v4 = vor.u32 %v3634_v60, %v2469_v59 }
  0x95   :  { %1829 = vmatpush.bf16.msra.mxu0 %v2550_v0  ;;  %1842 = vmatpush.bf16.msra.mxu1 %v2678_v1  ;;  %v2725_v0 = vld [vmem:[#allocation2 + $0x228] sm:$0xf]  ;;  %v3698_v1 = vld [vmem:[#allocation2 + $0x234] sm:$0xf0]  ;;  %v2598_v7 = vor.u32 %v3666_v63, %v2597_v61 }
  0x96   :  { %1855 = vmatpush.bf16.msra.mxu2 %v2806_v2  ;;  %v2853_v2 = vld [vmem:[#allocation2 + $0x328] sm:$0xf]  ;;  %v3730_v3 = vld [vmem:[#allocation2 + $0x334] sm:$0xf0]  ;;  %v2726_v10 = vor.u32 %v3698_v1, %v2725_v0 }
  0x97   :  { %1868 = vmatpush.bf16.msra.mxu3 %v2934_v6  ;;  %v2453_v5 = vld [vmem:[#allocation2 + $0x8] sm:$0xf]  ;;  %v3630_v6 = vld [vmem:[#allocation2 + $0x14] sm:$0xf0] }
  0x98   :  { %v2581_v11 = vld [vmem:[#allocation2 + $0x108] sm:$0xf]  ;;  %v3662_v12 = vld [vmem:[#allocation2 + $0x114] sm:$0xf0]  ;;  %v2454_v22 = vor.u32 %v3630_v6, %v2453_v5  ;;  %v4098_v6 = vld [vmem:[%s4170_s2] sm:$0xf] }
  0x99   :  { %1830 = vmatpush.bf16.msra.mxu0 %v2534_v14  ;;  %1843 = vmatpush.bf16.msra.mxu1 %v2662_v16  ;;  %v2709_v13 = vld [vmem:[#allocation2 + $0x208] sm:$0xf]  ;;  %v2854_v14 = vor.u32 %v3730_v3, %v2853_v2  ;;  %v3694_v16 = vld [vmem:[#allocation2 + $0x214] sm:$0xf0]  ;;  %v2582_v27 = vor.u32 %v3662_v12, %v2581_v11 }
  0x9a   :  { %1856 = vmatpush.bf16.msra.mxu2 %v2790_v17  ;;  %v2837_v17 = vld [vmem:[#allocation2 + $0x308] sm:$0xf]  ;;  %v3726_v18 = vld [vmem:[#allocation2 + $0x314] sm:$0xf0] }
  0x9b   :  { %1869 = vmatpush.bf16.msra.mxu3 %v2918_v21  ;;  %v3077_v19 = vld [vmem:[#allocation2 + $0x4e8] sm:$0xf]  ;;  %v3786_v20 = vld [vmem:[#allocation2 + $0x4f4] sm:$0xf0]  ;;  %v2838_v31 = vor.u32 %v3726_v18, %v2837_v17  ;;  %v332_v18 = vperm.slane %v4098_v6, 0 }
  0x9c   :  { %v3205_v21 = vld [vmem:[#allocation2 + $0x5e8] sm:$0xf]  ;;  %v3818_v23 = vld [vmem:[#allocation2 + $0x5f4] sm:$0xf0]  ;;  %v3078_v32 = vor.u32 %v3786_v20, %v3077_v19 }
  0x9d   :  { %1831 = vmatpush.bf16.msra.mxu0 %v2518_v28  ;;  %1844 = vmatpush.bf16.msra.mxu1 %v2646_v29  ;;  %v3333_v24 = vld [vmem:[#allocation2 + $0x6e8] sm:$0xf]  ;;  %v3850_v26 = vld [vmem:[#allocation2 + $0x6f4] sm:$0xf0]  ;;  %v2710_v28 = vor.u32 %v3694_v16, %v2709_v13  ;;  %v3206_v33 = vor.u32 %v3818_v23, %v3205_v21 }
  0x9e   :  { %1857 = vmatpush.bf16.msra.mxu2 %v2774_v30  ;;  %v3461_v29 = vld [vmem:[#allocation2 + $0x7e8] sm:$0xf]  ;;  %v3882_v30 = vld [vmem:[#allocation2 + $0x7f4] sm:$0xf0] }
  0x9f   :  { %1870 = vmatpush.bf16.msra.mxu3 %v2902_v35  ;;  %v3334_v35 = vor.u32 %v3850_v26, %v3333_v24  ;;  %v3061_v36 = vld [vmem:[#allocation2 + $0x4c8] sm:$0xf]  ;;  %v3782_v39 = vld [vmem:[#allocation2 + $0x4d4] sm:$0xf0]  ;;  %v3462_v42 = vor.u32 %v3882_v30, %v3461_v29 }
  0xa0   :  { %v3189_v41 = vld [vmem:[#allocation2 + $0x5c8] sm:$0xf]  ;;  %v3814_v43 = vld [vmem:[#allocation2 + $0x5d4] sm:$0xf0]  ;;  %v3062_v48 = vor.u32 %v3782_v39, %v3061_v36 }
  0xa1   :  { %1832 = vmatpush.bf16.msra.mxu0 %v2502_v44  ;;  %1845 = vmatpush.bf16.msra.mxu1 %v2630_v45  ;;  %v3317_v44 = vld [vmem:[#allocation2 + $0x6c8] sm:$0xf]  ;;  %v3846_v45 = vld [vmem:[#allocation2 + $0x6d4] sm:$0xf0]  ;;  %v3190_v49 = vor.u32 %v3814_v43, %v3189_v41 }
  0xa2   :  { %1858 = vmatpush.bf16.msra.mxu2 %v2758_v46  ;;  %v3445_v46 = vld [vmem:[#allocation2 + $0x7c8] sm:$0xf]  ;;  %v3878_v47 = vld [vmem:[#allocation2 + $0x7d4] sm:$0xf0] }
  0xa3   :  { %1871 = vmatpush.bf16.msra.mxu3 %v2886_v50  ;;  %v3318_v50 = vor.u32 %v3846_v45, %v3317_v44  ;;  %v3045_v51 = vld [vmem:[#allocation2 + $0x4a8] sm:$0xf]  ;;  %v3778_v52 = vld [vmem:[#allocation2 + $0x4b4] sm:$0xf0]  ;;  %v3446_v54 = vor.u32 %v3878_v47, %v3445_v46 }
  0xa4   :  { %v3173_v53 = vld [vmem:[#allocation2 + $0x5a8] sm:$0xf]  ;;  %v3810_v55 = vld [vmem:[#allocation2 + $0x5b4] sm:$0xf0]  ;;  %v3046_v60 = vor.u32 %v3778_v52, %v3045_v51 }
  0xa5   :  { %1833 = vmatpush.bf16.msra.mxu0 %v2486_v56  ;;  %1846 = vmatpush.bf16.msra.mxu1 %v2614_v57  ;;  %v3301_v56 = vld [vmem:[#allocation2 + $0x6a8] sm:$0xf]  ;;  %v3842_v57 = vld [vmem:[#allocation2 + $0x6b4] sm:$0xf0] }
  0xa6   :  { %1859 = vmatpush.bf16.msra.mxu2 %v2742_v58  ;;  %v3429_v58 = vld [vmem:[#allocation2 + $0x7a8] sm:$0xf]  ;;  %v3874_v59 = vld [vmem:[#allocation2 + $0x7b4] sm:$0xf0]  ;;  %v3302_v63 = vor.u32 %v3842_v57, %v3301_v56 }
  0xa7   :  { %1872 = vmatpush.bf16.msra.mxu3 %v2870_v62  ;;  %v3029_v61 = vld [vmem:[#allocation2 + $0x488] sm:$0xf]  ;;  %v3174_v62 = vor.u32 %v3810_v55, %v3173_v53  ;;  %v3774_v0 = vld [vmem:[#allocation2 + $0x494] sm:$0xf0]  ;;  %v3430_v3 = vor.u32 %v3874_v59, %v3429_v58 }
  0xa8   :  { %v3157_v1 = vld [vmem:[#allocation2 + $0x588] sm:$0xf]  ;;  %v3806_v2 = vld [vmem:[#allocation2 + $0x594] sm:$0xf0]  ;;  %v3030_v11 = vor.u32 %v3774_v0, %v3029_v61 }
  0xa9   :  { %1834 = vmatpush.bf16.msra.mxu0 %v2470_v4  ;;  %1847 = vmatpush.bf16.msra.mxu1 %v2598_v7  ;;  %v3285_v4 = vld [vmem:[#allocation2 + $0x688] sm:$0xf]  ;;  %v3838_v5 = vld [vmem:[#allocation2 + $0x694] sm:$0xf0]  ;;  %v3158_v13 = vor.u32 %v3806_v2, %v3157_v1 }
  0xaa   :  { %1860 = vmatpush.bf16.msra.mxu2 %v2726_v10  ;;  %v3413_v7 = vld [vmem:[#allocation2 + $0x788] sm:$0xf]  ;;  %v3870_v10 = vld [vmem:[#allocation2 + $0x794] sm:$0xf0] }
  0xab   :  { %1873 = vmatpush.bf16.msra.mxu3 %v2854_v14  ;;  %v3013_v12 = vld [vmem:[#allocation2 + $0x468] sm:$0xf]  ;;  %v3286_v14 = vor.u32 %v3838_v5, %v3285_v4  ;;  %v3770_v16 = vld [vmem:[#allocation2 + $0x474] sm:$0xf0]  ;;  %v3414_v19 = vor.u32 %v3870_v10, %v3413_v7 }
  0xac   :  { %v3141_v17 = vld [vmem:[#allocation2 + $0x568] sm:$0xf]  ;;  %v3802_v20 = vld [vmem:[#allocation2 + $0x574] sm:$0xf0]  ;;  %v3014_v26 = vor.u32 %v3770_v16, %v3013_v12  ;;  %v1642_v45 = vpop.f32.mrf.mxu1  ;;  %v2567_v16 = vld [vmem:[#allocation2 + $0xf8] sm:$0xf0] }
  0xad   :  { %1835 = vmatpush.bf16.msra.mxu0 %v2454_v22  ;;  %1848 = vmatpush.bf16.msra.mxu1 %v2582_v27  ;;  %v3269_v21 = vld [vmem:[#allocation2 + $0x668] sm:$0xf]  ;;  %v3834_v22 = vld [vmem:[#allocation2 + $0x674] sm:$0xf0] }
  0xae   :  { %1861 = vmatpush.bf16.msra.mxu2 %v2710_v28  ;;  %v3397_v23 = vld [vmem:[#allocation2 + $0x768] sm:$0xf]  ;;  %v3866_v24 = vld [vmem:[#allocation2 + $0x774] sm:$0xf0]  ;;  %v3142_v28 = vor.u32 %v3802_v20, %v3141_v17  ;;  %v3270_v29 = vor.u32 %v3834_v22, %v3269_v21  ;;  %v3688_v17 = vld [vmem:[#allocation2 + $0x1ec] sm:$0xf] }
  0xaf   :  { %1874 = vmatpush.bf16.msra.mxu3 %v2838_v31  ;;  %v2997_v30 = vld [vmem:[#allocation2 + $0x448] sm:$0xf]  ;;  %v3766_v31 = vld [vmem:[#allocation2 + $0x454] sm:$0xf0]  ;;  %v3720_v20 = vld [vmem:[#allocation2 + $0x2ec] sm:$0xf] }
  0xb0   :  { %1836 = vmatmul.bf16.vlgmr.msra.gmra.mxu0 %v4043_v9  ;;  %1849 = vmatmul.bf16.vlgmr.msra.gmra.mxu1 %v4056_v25  ;;  %v3798_v36 = vld [vmem:[#allocation2 + $0x554] sm:$0xf0]  ;;  %v3253_v39 = vld [vmem:[#allocation2 + $0x648] sm:$0xf]  ;;  %v2998_v44 = vor.u32 %v3766_v31, %v2997_v30  ;;  %v2823_v21 = vld [vmem:[#allocation2 + $0x2f8] sm:$0xf0] }
  0xb1   :  { %1880 = vmatpush.bf16.msrb.mxu0 %v3078_v32  ;;  %1893 = vmatpush.bf16.msrb.mxu1 %v3206_v33  ;;  %v3125_v32 = vld [vmem:[#allocation2 + $0x548] sm:$0xf]  ;;  %v3830_v41 = vld [vmem:[#allocation2 + $0x654] sm:$0xf0] }
  0xb2   :  { %1906 = vmatpush.bf16.msrb.mxu2 %v3334_v35  ;;  %1875 = vmatmul.bf16.vlgmr.msra.gmra.mxu3 %v4048_v15  ;;  %v3398_v35 = vor.u32 %v3866_v24, %v3397_v23  ;;  %v3862_v43 = vld [vmem:[#allocation2 + $0x754] sm:$0xf0]  ;;  %v3126_v46 = vor.u32 %v3798_v36, %v3125_v32  ;;  %v3254_v47 = vor.u32 %v3830_v41, %v3253_v39  ;;  %v3365_v57 = vld [vmem:[#allocation2 + $0x728] sm:$0xf]  ;;  %v3684_v36 = vld [vmem:[#allocation2 + $0x1cc] sm:$0xf] }
  0xb3   :  { %1919 = vmatpush.bf16.msrb.mxu3 %v3462_v42  ;;  %1862 = vmatmul.bf16.vlgmr.msra.gmra.mxu2 %v4041_v8  ;;  %v3381_v42 = vld [vmem:[#allocation2 + $0x748] sm:$0xf]  ;;  %v3794_v53 = vld [vmem:[#allocation2 + $0x534] sm:$0xf0]  ;;  %v2826_v32 = vor.u32 %v3720_v20, %v2823_v21 }
  0xb4   :  { %v3382_v52 = vor.u32 %v3862_v43, %v3381_v42  ;;  %v3826_v55 = vld [vmem:[#allocation2 + $0x634] sm:$0xf0]  ;;  %v3221_v5 = vld [vmem:[#allocation2 + $0x608] sm:$0xf]  ;;  %v1644_v22 = vpop.f32.mrf.mxu1  ;;  %v2679_v42 = vld [vmem:[#allocation2 + $0x1d8] sm:$0xf0] }
  0xb5   :  { %1881 = vmatpush.bf16.msrb.mxu0 %v3062_v48  ;;  %1894 = vmatpush.bf16.msrb.mxu1 %v3190_v49  ;;  %v2981_v48 = vld [vmem:[#allocation2 + $0x428] sm:$0xf]  ;;  %v3762_v49 = vld [vmem:[#allocation2 + $0x434] sm:$0xf0]  ;;  %v3716_v43 = vld [vmem:[#allocation2 + $0x2cc] sm:$0xf] }
  0xb6   :  { %1907 = vmatpush.bf16.msrb.mxu2 %v3318_v50  ;;  %v3109_v50 = vld [vmem:[#allocation2 + $0x528] sm:$0xf]  ;;  %v3858_v58 = vld [vmem:[#allocation2 + $0x734] sm:$0xf0]  ;;  %v2982_v61 = vor.u32 %v3762_v49, %v2981_v48  ;;  %v2682_v48 = vor.u32 %v3684_v36, %v2679_v42  ;;  %v2631_v22 = vld [vmem:[#allocation2 + $0x178] sm:$0xf0] }
  0xb7   :  { %1920 = vmatpush.bf16.msrb.mxu3 %v3446_v54  ;;  %v3237_v54 = vld [vmem:[#allocation2 + $0x628] sm:$0xf]  ;;  %v3110_v1 = vor.u32 %v3794_v53, %v3109_v50  ;;  %v3790_v4 = vld [vmem:[#allocation2 + $0x514] sm:$0xf0]  ;;  %v3366_v10 = vor.u32 %v3858_v58, %v3365_v57  ;;  %v3648_v50 = vld [vmem:[#allocation2 + $0xac] sm:$0xf] }
  0xb8   :  { %v3238_v2 = vor.u32 %v3826_v55, %v3237_v54  ;;  %v3349_v12 = vld [vmem:[#allocation2 + $0x708] sm:$0xf]  ;;  %v2663_v54 = vld [vmem:[#allocation2 + $0x1b8] sm:$0xf0]  ;;  %v3712_v55 = vld [vmem:[#allocation2 + $0x2ac] sm:$0xf] }
  0xb9   :  { %1882 = vmatpush.bf16.msrb.mxu0 %v3046_v60  ;;  %1895 = vmatpush.bf16.msrb.mxu1 %v3174_v62  ;;  %v1629_v27 = vpop.f32.mrf.mxu0  ;;  %v1668_v60 = vpop.f32.mrf.mxu3  ;;  %v2965_v62 = vld [vmem:[#allocation2 + $0x408] sm:$0xf]  ;;  %v3744_v57 = vld [vmem:[#allocation2 + $0x3ac] sm:$0xf]  ;;  %v2919_v58 = vld [vmem:[#allocation2 + $0x3b8] sm:$0xf0] }
  0xba   :  { %1908 = vmatpush.bf16.msrb.mxu2 %v3302_v63  ;;  %v1630_v33 = vadd.f32 %v1629_v27, %v332_v18  ;;  %v3758_v63 = vld [vmem:[#allocation2 + $0x414] sm:$0xf0]  ;;  %v2951_v27 = vld [vmem:[#allocation2 + $0x3f8] sm:$0xf0] }
  0xbb   :  { %1921 = vmatpush.bf16.msrb.mxu3 %v3430_v3  ;;  %v3093_v3 = vld [vmem:[#allocation2 + $0x508] sm:$0xf]  ;;  %v2966_v18 = vor.u32 %v3758_v63, %v2965_v62  ;;  %v3644_v62 = vld [vmem:[#allocation2 + $0x8c] sm:$0xf]  ;;  %v2519_v63 = vld [vmem:[#allocation2 + $0x98] sm:$0xf0] }
  0xbc   :  { %v1643_v51 = vadd.f32 %v1642_v45, %v1630_v33  ;;  %v3094_v23 = vor.u32 %v3790_v4, %v3093_v3  ;;  %v3652_v33 = vld [vmem:[#allocation2 + $0xcc] sm:$0xf]  ;;  %v2775_v4 = vld [vmem:[#allocation2 + $0x298] sm:$0xf0] }
  0xbd   :  { %1883 = vmatpush.bf16.msrb.mxu0 %v3030_v11  ;;  %1896 = vmatpush.bf16.msrb.mxu1 %v3158_v13  ;;  %v3822_v11 = vld [vmem:[#allocation2 + $0x614] sm:$0xf0]  ;;  %v3748_v45 = vld [vmem:[#allocation2 + $0x3cc] sm:$0xf]  ;;  %v2743_v42 = vld [vmem:[#allocation2 + $0x258] sm:$0xf0] }
  0xbe   :  { %1909 = vmatpush.bf16.msrb.mxu2 %v3286_v14  ;;  %v1655_v56 = vpop.f32.mrf.mxu2  ;;  %v3854_v13 = vld [vmem:[#allocation2 + $0x714] sm:$0xf0]  ;;  %v3656_v14 = vld [vmem:[#allocation2 + $0xec] sm:$0xf]  ;;  %v3222_v24 = vor.u32 %v3822_v11, %v3221_v5  ;;  %v2522_v11 = vor.u32 %v3644_v62, %v2519_v63 }
  0xbf   :  { %1922 = vmatpush.bf16.msrb.mxu3 %v3414_v19  ;;  %v1656_v59 = vadd.f32 %v1655_v56, %v1643_v51  ;;  %v2695_v19 = vld [vmem:[#allocation2 + $0x1f8] sm:$0xf0]  ;;  %v3708_v3 = vld [vmem:[#allocation2 + $0x28c] sm:$0xf] }
  0xc0   :  { %v2698_v31 = vor.u32 %v3688_v17, %v2695_v19  ;;  %v2535_v51 = vld [vmem:[#allocation2 + $0xb8] sm:$0xf0]  ;;  %v3740_v5 = vld [vmem:[#allocation2 + $0x38c] sm:$0xf] }
  0xc1   :  { %1884 = vmatpush.bf16.msrb.mxu0 %v3014_v26  ;;  %1897 = vmatpush.bf16.msrb.mxu1 %v3142_v28  ;;  %v1631_v0 = vpop.f32.mrf.mxu0  ;;  %v4101_v7 = vadd.f32 %v1668_v60, %v1656_v59  ;;  %v3752_v26 = vld [vmem:[#allocation2 + $0x3ec] sm:$0xf]  ;;  %v3350_v28 = vor.u32 %v3854_v13, %v3349_v12  ;;  %v1670_v39 = vpop.f32.mrf.mxu3  ;;  %v2791_v56 = vld [vmem:[#allocation2 + $0x2b8] sm:$0xf0]  ;;  %v2538_v59 = vor.u32 %v3648_v50, %v2535_v51 }
  0xc2   :  { %1910 = vmatpush.bf16.msrb.mxu2 %v3270_v29  ;;  %v2570_v29 = vor.u32 %v3656_v14, %v2567_v16  ;;  %v2954_v41 = vor.u32 %v3752_v26, %v2951_v27  ;;  %v3676_v0 = vld [vmem:[#allocation2 + $0x18c] sm:$0xf]  ;;  %v2778_v14 = vor.u32 %v3708_v3, %v2775_v4  ;;  %v2503_v17 = vld [vmem:[#allocation2 + $0x78] sm:$0xf0] }
  0xc3   :  { %1923 = vmatpush.bf16.msrb.mxu3 %v3398_v35  ;;  %v2551_v35 = vld [vmem:[#allocation2 + $0xd8] sm:$0xf0]  ;;  %v3640_v16 = vld [vmem:[#allocation2 + $0x6c] sm:$0xf] }
  0xc4   :  { %v3736_v26 = vld [vmem:[#allocation2 + $0x36c] sm:$0xf]  ;;  %v2887_v27 = vld [vmem:[#allocation2 + $0x378] sm:$0xf0] }
  0xc5   :  { %1885 = vmatpush.bf16.msrb.mxu0 %v2998_v44  ;;  %1898 = vmatpush.bf16.msrb.mxu1 %v3126_v46  ;;  %v2807_v44 = vld [vmem:[#allocation2 + $0x2d8] sm:$0xf0]  ;;  %v3628_v63 = vld [vmem:[#allocation2 + $0xc] sm:$0xf] }
  0xc6   :  { %1911 = vmatpush.bf16.msrb.mxu2 %v3254_v47  ;;  %v1657_v30 = vpop.f32.mrf.mxu2  ;;  %v2935_v46 = vld [vmem:[#allocation2 + $0x3d8] sm:$0xf0]  ;;  %v2554_v47 = vor.u32 %v3652_v33, %v2551_v35  ;;  %v2810_v49 = vor.u32 %v3716_v43, %v2807_v44  ;;  %v3668_v35 = vld [vmem:[#allocation2 + $0x14c] sm:$0xf] }
  0xc7   :  { %1924 = vmatpush.bf16.msrb.mxu3 %v3382_v52  ;;  %v3680_v52 = vld [vmem:[#allocation2 + $0x1ac] sm:$0xf]  ;;  %v2938_v53 = vor.u32 %v3748_v45, %v2935_v46  ;;  %v2487_v33 = vld [vmem:[#allocation2 + $0x58] sm:$0xf0] }
  0xc8   :  { %v2666_v60 = vor.u32 %v3680_v52, %v2663_v54  ;;  %v2615_v39 = vld [vmem:[#allocation2 + $0x158] sm:$0xf0]  ;;  %v3732_v45 = vld [vmem:[#allocation2 + $0x34c] sm:$0xf] }
  0xc9   :  { %1886 = vmatpush.bf16.msrb.mxu0 %v2982_v61  ;;  %1899 = vmatpush.bf16.msrb.mxu1 %v3110_v1  ;;  %v2794_v61 = vor.u32 %v3712_v55, %v2791_v56  ;;  %v2922_v1 = vor.u32 %v3744_v57, %v2919_v58  ;;  %v2871_v46 = vld [vmem:[#allocation2 + $0x358] sm:$0xf0]  ;;  %v2618_v50 = vor.u32 %v3668_v35, %v2615_v39  ;;  %v3632_v52 = vld [vmem:[#allocation2 + $0x2c] sm:$0xf] }
  0xca   :  { %1912 = vmatpush.bf16.msrb.mxu2 %v3238_v2  ;;  %v2647_v2 = vld [vmem:[#allocation2 + $0x198] sm:$0xf0]  ;;  %v3664_v54 = vld [vmem:[#allocation2 + $0x12c] sm:$0xf]  ;;  %v2874_v56 = vor.u32 %v3732_v45, %v2871_v46 }
  0xcb   :  { %1925 = vmatpush.bf16.msrb.mxu3 %v3366_v10  ;;  %v2903_v10 = vld [vmem:[#allocation2 + $0x398] sm:$0xf0]  ;;  %v2650_v13 = vor.u32 %v3676_v0, %v2647_v2  ;;  %v3696_v58 = vld [vmem:[#allocation2 + $0x22c] sm:$0xf] }
  0xcc   :  { %v2906_v21 = vor.u32 %v3740_v5, %v2903_v10  ;;  %v2599_v57 = vld [vmem:[#allocation2 + $0x138] sm:$0xf0]  ;;  %v3660_v3 = vld [vmem:[#allocation2 + $0x10c] sm:$0xf] }
  0xcd   :  { %1887 = vmatpush.bf16.msrb.mxu0 %v2966_v18  ;;  %1900 = vmatpush.bf16.msrb.mxu1 %v3094_v23  ;;  %v1681_v12 = vpop.f32.mrf.mxu0  ;;  %v3672_v18 = vld [vmem:[#allocation2 + $0x16c] sm:$0xf]  ;;  %v1694_v20 = vpop.f32.mrf.mxu1  ;;  %v2455_v0 = vld [vmem:[#allocation2 + $0x18] sm:$0xf0] }
  0xce   :  { %1913 = vmatpush.bf16.msrb.mxu2 %v3222_v24  ;;  %v1682_v19 = vadd.f32 %v1681_v12, %v4101_v7  ;;  %v3704_v23 = vld [vmem:[#allocation2 + $0x26c] sm:$0xf]  ;;  %v2759_v24 = vld [vmem:[#allocation2 + $0x278] sm:$0xf0]  ;;  %v2634_v30 = vor.u32 %v3672_v18, %v2631_v22  ;;  %v2890_v7 = vor.u32 %v3736_v26, %v2887_v27 }
  0xcf   :  { %1926 = vmatpush.bf16.msrb.mxu3 %v3350_v28  ;;  %v2583_v4 = vld [vmem:[#allocation2 + $0x118] sm:$0xf0]  ;;  %v3692_v5 = vld [vmem:[#allocation2 + $0x20c] sm:$0xf] }
  0xd0   :  { %1888 = vmatmul.bf16.vlgmr.msrb.gmra.mxu0 %v4073_v37  ;;  %1901 = vmatmul.bf16.vlgmr.msrb.gmra.mxu1 %v4077_v40  ;;  %v1695_v28 = vadd.f32 %v1694_v20, %v1682_v19  ;;  %v2711_v12 = vld [vmem:[#allocation2 + $0x218] sm:$0xf0]  ;;  %v3816_v19 = vld [vmem:[#allocation2 + $0x5ec] sm:$0xf]  ;;  %v2458_v20 = vor.u32 %v3628_v63, %v2455_v0 }
  0xd1   :  { %1932 = vmatpush.bf16.msra.mxu0 %v2570_v29  ;;  %1945 = vmatpush.bf16.msra.mxu1 %v2698_v31  ;;  %v2506_v29 = vor.u32 %v3640_v16, %v2503_v17  ;;  %v2762_v31 = vor.u32 %v3704_v23, %v2759_v24  ;;  %v3784_v17 = vld [vmem:[#allocation2 + $0x4ec] sm:$0xf]  ;;  %v3079_v18 = vld [vmem:[#allocation2 + $0x4f8] sm:$0xf0]  ;;  %v2586_v24 = vor.u32 %v3660_v3, %v2583_v4 }
  0xd2   :  { %1958 = vmatpush.bf16.msra.mxu2 %v2826_v32  ;;  %1927 = vmatmul.bf16.vlgmr.msrb.gmra.mxu3 %v4075_v38  ;;  %v3636_v32 = vld [vmem:[#allocation2 + $0x4c] sm:$0xf]  ;;  %v3335_v23 = vld [vmem:[#allocation2 + $0x6f8] sm:$0xf0]  ;;  %v2714_v26 = vor.u32 %v3692_v5, %v2711_v12 }
  0xd3   :  { %1971 = vmatpush.bf16.msra.mxu3 %v2954_v41  ;;  %1914 = vmatmul.bf16.vlgmr.msrb.gmra.mxu2 %v4071_v34  ;;  %v3700_v41 = vld [vmem:[#allocation2 + $0x24c] sm:$0xf]  ;;  %v3063_v35 = vld [vmem:[#allocation2 + $0x4d8] sm:$0xf0] }
  0xd4   :  { %v2746_v51 = vor.u32 %v3700_v41, %v2743_v42  ;;  %v3848_v22 = vld [vmem:[#allocation2 + $0x6ec] sm:$0xf]  ;;  %v3191_v39 = vld [vmem:[#allocation2 + $0x5d8] sm:$0xf0] }
  0xd5   :  { %1933 = vmatpush.bf16.msra.mxu0 %v2554_v47  ;;  %1946 = vmatpush.bf16.msra.mxu1 %v2682_v48  ;;  %v1720_v44 = vpop.f32.mrf.mxu3  ;;  %v2490_v47 = vor.u32 %v3636_v32, %v2487_v33  ;;  %v1696_v55 = vpop.f32.mrf.mxu1  ;;  %v3880_v27 = vld [vmem:[#allocation2 + $0x7ec] sm:$0xf]  ;;  %v3338_v32 = vor.u32 %v3848_v22, %v3335_v23  ;;  %v3319_v42 = vld [vmem:[#allocation2 + $0x6d8] sm:$0xf0] }
  0xd6   :  { %1959 = vmatpush.bf16.msra.mxu2 %v2810_v49  ;;  %v1707_v36 = vpop.f32.mrf.mxu2  ;;  %v1683_v49 = vpop.f32.mrf.mxu0  ;;  %v3780_v33 = vld [vmem:[#allocation2 + $0x4cc] sm:$0xf]  ;;  %v3303_v55 = vld [vmem:[#allocation2 + $0x6b8] sm:$0xf0] }
  0xd7   :  { %1972 = vmatpush.bf16.msra.mxu3 %v2938_v53  ;;  %v1708_v43 = vadd.f32 %v1707_v36, %v1695_v28  ;;  %v2471_v53 = vld [vmem:[#allocation2 + $0x38] sm:$0xf0]  ;;  %v3812_v36 = vld [vmem:[#allocation2 + $0x5cc] sm:$0xf]  ;;  %v3066_v45 = vor.u32 %v3780_v33, %v3063_v35 }
  0xd8   :  { %v2474_v62 = vor.u32 %v3632_v52, %v2471_v53  ;;  %v3463_v28 = vld [vmem:[#allocation2 + $0x7f8] sm:$0xf0]  ;;  %v3844_v41 = vld [vmem:[#allocation2 + $0x6cc] sm:$0xf]  ;;  %v3194_v46 = vor.u32 %v3812_v36, %v3191_v39 }
  0xd9   :  { %1934 = vmatpush.bf16.msra.mxu0 %v2538_v59  ;;  %1947 = vmatpush.bf16.msra.mxu1 %v2666_v60  ;;  %v4108_v48 = vadd.f32 %v1720_v44, %v1708_v43  ;;  %v2727_v59 = vld [vmem:[#allocation2 + $0x238] sm:$0xf0]  ;;  %v3728_v60 = vld [vmem:[#allocation2 + $0x32c] sm:$0xf] }
  0xda   :  { %1960 = vmatpush.bf16.msra.mxu2 %v2794_v61  ;;  %v2855_v61 = vld [vmem:[#allocation2 + $0x338] sm:$0xf0]  ;;  %v2730_v2 = vor.u32 %v3696_v58, %v2727_v59  ;;  %v3876_v43 = vld [vmem:[#allocation2 + $0x7cc] sm:$0xf] }
  0xdb   :  { %1973 = vmatpush.bf16.msra.mxu3 %v2922_v1  ;;  %v2602_v1 = vor.u32 %v3664_v54, %v2599_v57  ;;  %v3447_v44 = vld [vmem:[#allocation2 + $0x7d8] sm:$0xf0]  ;;  %v3776_v49 = vld [vmem:[#allocation2 + $0x4ac] sm:$0xf] }
  0xdc   :  { %v3450_v52 = vor.u32 %v3876_v43, %v3447_v44  ;;  %v3175_v53 = vld [vmem:[#allocation2 + $0x5b8] sm:$0xf0]  ;;  %v3840_v54 = vld [vmem:[#allocation2 + $0x6ac] sm:$0xf] }
  0xdd   :  { %1935 = vmatpush.bf16.msra.mxu0 %v2522_v11  ;;  %1948 = vmatpush.bf16.msra.mxu1 %v2650_v13  ;;  %v2858_v11 = vor.u32 %v3728_v60, %v2855_v61  ;;  %v3724_v13 = vld [vmem:[#allocation2 + $0x30c] sm:$0xf]  ;;  %v1722_v16 = vpop.f32.mrf.mxu3  ;;  %v3431_v57 = vld [vmem:[#allocation2 + $0x7b8] sm:$0xf0]  ;;  %v3306_v60 = vor.u32 %v3840_v54, %v3303_v55 }
  0xde   :  { %1961 = vmatpush.bf16.msra.mxu2 %v2778_v14  ;;  %v1709_v10 = vpop.f32.mrf.mxu2  ;;  %v2839_v14 = vld [vmem:[#allocation2 + $0x318] sm:$0xf0]  ;;  %v3772_v61 = vld [vmem:[#allocation2 + $0x48c] sm:$0xf] }
  0xdf   :  { %1974 = vmatpush.bf16.msra.mxu3 %v2906_v21  ;;  %v3207_v21 = vld [vmem:[#allocation2 + $0x5f8] sm:$0xf0]  ;;  %v3868_v3 = vld [vmem:[#allocation2 + $0x78c] sm:$0xf] }
  0xe0   :  { %v3159_v0 = vld [vmem:[#allocation2 + $0x598] sm:$0xf0]  ;;  %v3768_v10 = vld [vmem:[#allocation2 + $0x46c] sm:$0xf] }
  0xe1   :  { %1936 = vmatpush.bf16.msra.mxu0 %v2506_v29  ;;  %1949 = vmatpush.bf16.msra.mxu1 %v2634_v30  ;;  %v2842_v29 = vor.u32 %v3724_v13, %v2839_v14  ;;  %v3082_v30 = vor.u32 %v3784_v17, %v3079_v18  ;;  %v3800_v12 = vld [vmem:[#allocation2 + $0x56c] sm:$0xf]  ;;  %v3143_v16 = vld [vmem:[#allocation2 + $0x578] sm:$0xf0] }
  0xe2   :  { %1962 = vmatpush.bf16.msra.mxu2 %v2762_v31  ;;  %v3210_v31 = vor.u32 %v3816_v19, %v3207_v21  ;;  %v3832_v17 = vld [vmem:[#allocation2 + $0x66c] sm:$0xf]  ;;  %v3271_v18 = vld [vmem:[#allocation2 + $0x678] sm:$0xf0]  ;;  %v3146_v22 = vor.u32 %v3800_v12, %v3143_v16 }
  0xe3   :  { %1975 = vmatpush.bf16.msra.mxu3 %v2890_v7  ;;  %v3466_v7 = vor.u32 %v3880_v27, %v3463_v28  ;;  %v3864_v19 = vld [vmem:[#allocation2 + $0x76c] sm:$0xf]  ;;  %v3274_v23 = vor.u32 %v3832_v17, %v3271_v18  ;;  %v3383_v36 = vld [vmem:[#allocation2 + $0x758] sm:$0xf0]  ;;  %v3897_v18 = vld [vmem:[#allocation4 + $0x70] sm:$0xff] }
  0xe4   :  { %v3796_v27 = vld [vmem:[#allocation2 + $0x54c] sm:$0xf]  ;;  %v2983_v44 = vld [vmem:[#allocation2 + $0x438] sm:$0xf0] }
  0xe5   :  { %1937 = vmatpush.bf16.msra.mxu0 %v2490_v47  ;;  %1950 = vmatpush.bf16.msra.mxu1 %v2618_v50  ;;  %v3322_v47 = vor.u32 %v3844_v41, %v3319_v42  ;;  %v3047_v50 = vld [vmem:[#allocation2 + $0x4b8] sm:$0xf0]  ;;  %v3860_v35 = vld [vmem:[#allocation2 + $0x74c] sm:$0xf] }
  0xe6   :  { %1963 = vmatpush.bf16.msra.mxu2 %v2746_v51  ;;  %v3808_v51 = vld [vmem:[#allocation2 + $0x5ac] sm:$0xf]  ;;  %v3050_v58 = vor.u32 %v3776_v49, %v3047_v50  ;;  %v3111_v49 = vld [vmem:[#allocation2 + $0x538] sm:$0xf0] }
  0xe7   :  { %1976 = vmatpush.bf16.msra.mxu3 %v2874_v56  ;;  %v3872_v56 = vld [vmem:[#allocation2 + $0x7ac] sm:$0xf]  ;;  %v3178_v59 = vor.u32 %v3808_v51, %v3175_v53  ;;  %v3239_v51 = vld [vmem:[#allocation2 + $0x638] sm:$0xf0] }
  0xe8   :  { %v3434_v63 = vor.u32 %v3872_v56, %v3431_v57  ;;  %v3760_v43 = vld [vmem:[#allocation2 + $0x42c] sm:$0xf]  ;;  %v3367_v53 = vld [vmem:[#allocation2 + $0x738] sm:$0xf0] }
  0xe9   :  { %1938 = vmatpush.bf16.msra.mxu0 %v2474_v62  ;;  %1951 = vmatpush.bf16.msra.mxu1 %v2602_v1  ;;  %v3031_v62 = vld [vmem:[#allocation2 + $0x498] sm:$0xf0]  ;;  %v3836_v1 = vld [vmem:[#allocation2 + $0x68c] sm:$0xf]  ;;  %v2986_v54 = vor.u32 %v3760_v43, %v2983_v44 }
  0xea   :  { %1964 = vmatpush.bf16.msra.mxu2 %v2730_v2  ;;  %v3287_v2 = vld [vmem:[#allocation2 + $0x698] sm:$0xf0]  ;;  %v3824_v50 = vld [vmem:[#allocation2 + $0x62c] sm:$0xf] }
  0xeb   :  { %1977 = vmatpush.bf16.msra.mxu3 %v2858_v11  ;;  %v3290_v5 = vor.u32 %v3836_v1, %v3287_v2  ;;  %v3015_v11 = vld [vmem:[#allocation2 + $0x478] sm:$0xf0]  ;;  %v3756_v55 = vld [vmem:[#allocation2 + $0x40c] sm:$0xf]  ;;  %v3242_v57 = vor.u32 %v3824_v50, %v3239_v51  ;;  %v3901_v50 = vld [vmem:[#allocation4 + $0x90] sm:$0xff] }
  0xec   :  { %v3018_v21 = vor.u32 %v3768_v10, %v3015_v11  ;;  %v3852_v2 = vld [vmem:[#allocation2 + $0x70c] sm:$0xf]  ;;  %v3890_v10 = vld [vmem:[#allocation4 + $0x38] sm:$0xff] }
  0xed   :  { %1939 = vmatpush.bf16.msra.mxu0 %v2458_v20  ;;  %1952 = vmatpush.bf16.msra.mxu1 %v2586_v24  ;;  %v4114_v4 = vpop.f32.mrf.mxu0  ;;  %v4116_v13 = vpop.f32.mrf.mxu1  ;;  %v3399_v20 = vld [vmem:[#allocation2 + $0x778] sm:$0xf0]  ;;  %v3764_v24 = vld [vmem:[#allocation2 + $0x44c] sm:$0xf] }
  0xee   :  { %1965 = vmatpush.bf16.msra.mxu2 %v2714_v26  ;;  %v2999_v26 = vld [vmem:[#allocation2 + $0x458] sm:$0xf0] }
  0xef   :  { %1978 = vmatpush.bf16.msra.mxu3 %v2842_v29  ;;  %v3402_v29 = vor.u32 %v3864_v19, %v3399_v20  ;;  %v3898_v12 = vld [vmem:[#allocation4 + $0x78] sm:$0xff]  ;;  %v3888_v19 = vld [vmem:[#allocation4 + $0x28] sm:$0xff] }
  0xf0   :  { %1940 = vmatmul.bf16.vlgmr.msra.gmra.mxu0 %v4043_v9  ;;  %1953 = vmatmul.bf16.vlgmr.msra.gmra.mxu1 %v4056_v25  ;;  %v3415_v9 = vld [vmem:[#allocation2 + $0x798] sm:$0xf0]  ;;  %v3896_v20 = vld [vmem:[#allocation4 + $0x68] sm:$0xff] }
  0xf1   :  { %1984 = vmatpush.bf16.msrb.mxu0 %v3082_v30  ;;  %1997 = vmatpush.bf16.msrb.mxu1 %v3210_v31  ;;  %v3418_v14 = vor.u32 %v3868_v3, %v3415_v9  ;;  %v3127_v30 = vld [vmem:[#allocation2 + $0x558] sm:$0xf0]  ;;  %v3828_v31 = vld [vmem:[#allocation2 + $0x64c] sm:$0xf] }
  0xf2   :  { %2010 = vmatpush.bf16.msrb.mxu2 %v3338_v32  ;;  %1979 = vmatmul.bf16.vlgmr.msra.gmra.mxu3 %v4048_v15  ;;  %v3034_v15 = vor.u32 %v3772_v61, %v3031_v62  ;;  %v3255_v32 = vld [vmem:[#allocation2 + $0x658] sm:$0xf0]  ;;  %v3130_v41 = vor.u32 %v3796_v27, %v3127_v30  ;;  %v3885_v30 = vld [vmem:[#allocation4 + $0x10] sm:$0xff] }
  0xf3   :  { %2023 = vmatpush.bf16.msrb.mxu3 %v3466_v7  ;;  %1966 = vmatmul.bf16.vlgmr.msra.gmra.mxu2 %v4041_v8  ;;  %v3804_v8 = vld [vmem:[#allocation2 + $0x58c] sm:$0xf]  ;;  %v3002_v7 = vor.u32 %v3764_v24, %v2999_v26  ;;  %v3258_v42 = vor.u32 %v3828_v31, %v3255_v32  ;;  %v3351_v3 = vld [vmem:[#allocation2 + $0x718] sm:$0xf0] }
  0xf4   :  { %v3162_v25 = vor.u32 %v3804_v8, %v3159_v0  ;;  %v3820_v8 = vld [vmem:[#allocation2 + $0x60c] sm:$0xf]  ;;  %v333_v0 = vperm.slane %v4098_v6, 1  ;;  %v3906_v17 = vld [vmem:[#allocation4 + $0xb8] sm:$0xff] }
  0xf5   :  { %1985 = vmatpush.bf16.msrb.mxu0 %v3066_v45  ;;  %1998 = vmatpush.bf16.msrb.mxu1 %v3194_v46  ;;  %v4120_v33 = vpop.f32.mrf.mxu3  ;;  %v1735_v39 = vpop.f32.mrf.mxu0  ;;  %v3792_v45 = vld [vmem:[#allocation2 + $0x52c] sm:$0xf]  ;;  %v3894_v26 = vld [vmem:[#allocation4 + $0x58] sm:$0xff] }
  0xf6   :  { %2011 = vmatpush.bf16.msrb.mxu2 %v3322_v47  ;;  %v4118_v28 = vpop.f32.mrf.mxu2  ;;  %v1748_v46 = vpop.f32.mrf.mxu1  ;;  %v3386_v47 = vor.u32 %v3860_v35, %v3383_v36  ;;  %v3114_v56 = vor.u32 %v3792_v45, %v3111_v49  ;;  %v1734_v11 = vadd.f32 %v4114_v4, %v333_v0  ;;  %v3904_v24 = vld [vmem:[#allocation4 + $0xa8] sm:$0xff]  ;;  %v3902_v36 = vld [vmem:[#allocation4 + $0x98] sm:$0xff]  ;;  %v3883_v45 = vld [vmem:[#allocation4] sm:$0xff]  ;;  %v2036_v49 = vpack.c.bf16 %v4108_v48, %v4108_v48 }
  0xf7   :  { %2024 = vmatpush.bf16.msrb.mxu3 %v3450_v52  ;;  %v3856_v52 = vld [vmem:[#allocation2 + $0x72c] sm:$0xf]  ;;  %v3891_v46 = vld [vmem:[#allocation4 + $0x40] sm:$0xff] }
  0xf8   :  { %v3370_v62 = vor.u32 %v3856_v52, %v3367_v53  ;;  %v1747_v16 = vadd.f32 %v4116_v13, %v1734_v11  ;;  %v3884_v39 = vld [vmem:[#allocation4 + $0x8] sm:$0xff] }
  0xf9   :  { %1986 = vmatpush.bf16.msrb.mxu0 %v3050_v58  ;;  %1999 = vmatpush.bf16.msrb.mxu1 %v3178_v59  ;;  %v2967_v58 = vld [vmem:[#allocation2 + $0x418] sm:$0xf0]  ;;  %v3788_v59 = vld [vmem:[#allocation2 + $0x50c] sm:$0xf] }
  0xfa   :  { %2012 = vmatpush.bf16.msrb.mxu2 %v3306_v60  ;;  %v3095_v60 = vld [vmem:[#allocation2 + $0x518] sm:$0xf0]  ;;  %v2970_v9 = vor.u32 %v3756_v55, %v2967_v58  ;;  %v1760_v4 = vadd.f32 %v4118_v28, %v1747_v16  ;;  %v3900_v53 = vld [vmem:[#allocation4 + $0x88] sm:$0xff] }
  0xfb   :  { %2025 = vmatpush.bf16.msrb.mxu3 %v3434_v63  ;;  %v3223_v63 = vld [vmem:[#allocation2 + $0x618] sm:$0xf0] }
  0xfc   :  { %v1773_v13 = vadd.f32 %v4120_v33, %v1760_v4  ;;  %v3893_v33 = vld [vmem:[#allocation4 + $0x50] sm:$0xff] }
  0xfd   :  { %1987 = vmatpush.bf16.msrb.mxu0 %v3034_v15  ;;  %2000 = vmatpush.bf16.msrb.mxu1 %v3162_v25  ;;  %v1774_v1 = vpop.f32.mrf.mxu3  ;;  %v3098_v15 = vor.u32 %v3788_v59, %v3095_v60  ;;  %v3226_v25 = vor.u32 %v3820_v8, %v3223_v63  ;;  %v334_v59 = vperm.slane %v4098_v6, 2 }
  0xfe   :  { %2013 = vmatpush.bf16.msrb.mxu2 %v3290_v5  ;;  %v1761_v61 = vpop.f32.mrf.mxu2  ;;  %v3354_v5 = vor.u32 %v3852_v2, %v3351_v3 }
  0xff   :  { %2026 = vmatpush.bf16.msrb.mxu3 %v3418_v14  ;;  %v3889_v14 = vld [vmem:[#allocation4 + $0x30] sm:$0xff] }
 0x101   :  { %1988 = vmatpush.bf16.msrb.mxu0 %v3018_v21  ;;  %2001 = vmatpush.bf16.msrb.mxu1 %v3146_v22  ;;  %v3905_v21 = vld [vmem:[#allocation4 + $0xb0] sm:$0xff]  ;;  %v3887_v22 = vld [vmem:[#allocation4 + $0x20] sm:$0xff] }
 0x102   :  { %2014 = vmatpush.bf16.msrb.mxu2 %v3274_v23  ;;  %v3895_v23 = vld [vmem:[#allocation4 + $0x60] sm:$0xff] }
 0x103   :  { %2027 = vmatpush.bf16.msrb.mxu3 %v3402_v29  ;;  %v3903_v29 = vld [vmem:[#allocation4 + $0xa0] sm:$0xff] }
 0x105   :  { %1989 = vmatpush.bf16.msrb.mxu0 %v3002_v7  ;;  %2002 = vmatpush.bf16.msrb.mxu1 %v3130_v41  ;;  %v3892_v41 = vld [vmem:[#allocation4 + $0x48] sm:$0xff] }
 0x106   :  { %2015 = vmatpush.bf16.msrb.mxu2 %v3258_v42 }
 0x107   :  { %2028 = vmatpush.bf16.msrb.mxu3 %v3386_v47 }
 0x109   :  { %1990 = vmatpush.bf16.msrb.mxu0 %v2986_v54  ;;  %2003 = vmatpush.bf16.msrb.mxu1 %v3114_v56 }
 0x10a   :  { %2016 = vmatpush.bf16.msrb.mxu2 %v3242_v57  ;;  %v3899_v57 = vld [vmem:[#allocation4 + $0x80] sm:$0xff] }
 0x10b   :  { %2029 = vmatpush.bf16.msrb.mxu3 %v3370_v62 }
 0x10d   :  { %1991 = vmatpush.bf16.msrb.mxu0 %v2970_v9  ;;  %2004 = vmatpush.bf16.msrb.mxu1 %v3098_v15  ;;  %v3914_v9 = vld [vmem:[#allocation4 + $0xf8] sm:$0xff] }
 0x10e   :  { %2017 = vmatpush.bf16.msrb.mxu2 %v3226_v25 }
 0x10f   :  { %2030 = vmatpush.bf16.msrb.mxu3 %v3354_v5 }
 0x110   :  { %1992 = vmatmul.bf16.vlgmr.msrb.gmra.mxu0 %v4073_v37  ;;  %2005 = vmatmul.bf16.vlgmr.msrb.gmra.mxu1 %v4077_v40  ;;  %v1785_v37 = vpop.f32.mrf.mxu0  ;;  %v1798_v40 = vpop.f32.mrf.mxu1 }
 0x111   :  { %2300 = vmatpush.bf16.msra.mxu0 %v3890_v10  ;;  %2313 = vmatpush.bf16.msra.mxu1 %v3898_v12  ;;  %v3913_v10 = vld [vmem:[#allocation4 + $0xf0] sm:$0xff] }
 0x112   :  { %2018 = vmatmul.bf16.vlgmr.msrb.gmra.mxu2 %v4071_v34  ;;  %2031 = vmatmul.bf16.vlgmr.msrb.gmra.mxu3 %v4075_v38  ;;  %v3886_v34 = vld [vmem:[#allocation4 + $0x18] sm:$0xff]  ;;  %v1786_v38 = vadd.f32 %v1785_v37, %v1773_v13  ;;  %v3908_v37 = vld [vmem:[#allocation4 + $0xc8] sm:$0xff] }
 0x113   :  { %2326 = vmatpush.bf16.msra.mxu2 %v3906_v17  ;;  %2339 = vmatpush.bf16.msra.mxu3 %v3914_v9  ;;  %v3912_v17 = vld [vmem:[#allocation4 + $0xe8] sm:$0xff] }
 0x114   :  { %v1799_v31 = vadd.f32 %v1798_v40, %v1786_v38 }
 0x115   :  { %2301 = vmatpush.bf16.msra.mxu0 %v3889_v14  ;;  %2314 = vmatpush.bf16.msra.mxu1 %v3897_v18  ;;  %v1824_v28 = vpop.f32.mrf.mxu3 }
 0x116   :  { %v1811_v27 = vpop.f32.mrf.mxu2 }
 0x117   :  { %2327 = vmatpush.bf16.msra.mxu2 %v3905_v21  ;;  %v1812_v7 = vadd.f32 %v1811_v27, %v1799_v31  ;;  %2340 = vmatpush.bf16.msra.mxu3 %v3913_v10  ;;  %v3909_v21 = vld [vmem:[#allocation4 + $0xd0] sm:$0xff] }
 0x118   :  { %v1787_v32 = vpop.f32.mrf.mxu0  ;;  %v1800_v35 = vpop.f32.mrf.mxu1 }
 0x119   :  { %2302 = vmatpush.bf16.msra.mxu0 %v3888_v19  ;;  %2315 = vmatpush.bf16.msra.mxu1 %v3896_v20  ;;  %v1825_v44 = vadd.f32 %v1824_v28, %v1812_v7  ;;  %v3911_v19 = vld [vmem:[#allocation4 + $0xe0] sm:$0xff]  ;;  %v3910_v20 = vld [vmem:[#allocation4 + $0xd8] sm:$0xff] }
 0x11b   :  { %2328 = vmatpush.bf16.msra.mxu2 %v3904_v24  ;;  %v2037_v47 = vpack.c.bf16 %v1825_v44, %v1825_v44  ;;  %2341 = vmatpush.bf16.msra.mxu3 %v3912_v17 }
 0x11d   :  { %2303 = vmatpush.bf16.msra.mxu0 %v3887_v22  ;;  %2316 = vmatpush.bf16.msra.mxu1 %v3895_v23  ;;  %v1826_v43 = vpop.f32.mrf.mxu3 }
 0x11e   :  { %v1813_v42 = vpop.f32.mrf.mxu2 }
 0x11f   :  { %2329 = vmatpush.bf16.msra.mxu2 %v3903_v29  ;;  %2342 = vmatpush.bf16.msra.mxu3 %v3911_v19 }
 0x121   :  { %2304 = vmatpush.bf16.msra.mxu0 %v3886_v34  ;;  %2317 = vmatpush.bf16.msra.mxu1 %v3894_v26  ;;  %v3907_v34 = vld [vmem:[#allocation4 + $0xc0] sm:$0xff]  ;;  %v335_v26 = vperm.slane %v4098_v6, 3 }
 0x123   :  { %2330 = vmatpush.bf16.msra.mxu2 %v3902_v36  ;;  %2343 = vmatpush.bf16.msra.mxu3 %v3910_v20 }
 0x125   :  { %2305 = vmatpush.bf16.msra.mxu0 %v3885_v30  ;;  %2318 = vmatpush.bf16.msra.mxu1 %v3893_v33 }
 0x127   :  { %2331 = vmatpush.bf16.msra.mxu2 %v3901_v50  ;;  %2344 = vmatpush.bf16.msra.mxu3 %v3909_v21 }
 0x129   :  { %2306 = vmatpush.bf16.msra.mxu0 %v3884_v39  ;;  %2319 = vmatpush.bf16.msra.mxu1 %v3892_v41 }
 0x12b   :  { %2332 = vmatpush.bf16.msra.mxu2 %v3900_v53  ;;  %2345 = vmatpush.bf16.msra.mxu3 %v3908_v37 }
 0x12d   :  { %2307 = vmatpush.bf16.msra.mxu0 %v3883_v45  ;;  %2320 = vmatpush.bf16.msra.mxu1 %v3891_v46  ;;  %v1837_v51 = vpop.f32.mrf.mxu0  ;;  %v1850_v52 = vpop.f32.mrf.mxu1 }
 0x12e   :  { %v1838_v48 = vadd.f32 %v1837_v51, %v334_v59  ;;  %v3919_v59 = vld [vmem:[%s4173_s5 + $0x20] sm:$0xff] }
 0x12f   :  { %2333 = vmatpush.bf16.msra.mxu2 %v3899_v57  ;;  %2346 = vmatpush.bf16.msra.mxu3 %v3907_v34  ;;  %v3921_v57 = vld [vmem:[%s4173_s5 + $0x30] sm:$0xff] }
 0x130   :  { %2308 = vmatmul.bf16.vlgmr.msra.gmra.mxu0 %v2036_v49  ;;  %2321 = vmatmul.bf16.vlgmr.msra.gmra.mxu1 %v2037_v47  ;;  %v1851_v62 = vadd.f32 %v1850_v52, %v1838_v48  ;;  %v3929_v49 = vld [vmem:[%s4172_s4] ss:$0 sm:$0xff] }
 0x135   :  { %v1876_v55 = vpop.f32.mrf.mxu3  ;;  %v1839_v56 = vpop.f32.mrf.mxu0 }
 0x136   :  { %v1863_v54 = vpop.f32.mrf.mxu2  ;;  %v1852_v58 = vpop.f32.mrf.mxu1  ;;  %v3922_v56 = vld [vmem:[%s4173_s5 + $0x38] sm:$0xff] }
 0x137   :  { %v1864_v8 = vadd.f32 %v1863_v54, %v1851_v62  ;;  %2422 = vmatpush.bf16.msrb.mxu0 %v3922_v56  ;;  %v3920_v58 = vld [vmem:[%s4173_s5 + $0x28] sm:$0xff] }
 0x139   :  { %v1877_v63 = vadd.f32 %v1876_v55, %v1864_v8  ;;  %v3916_v8 = vld [vmem:[%s4173_s5 + $0x8] sm:$0xff] }
 0x13b   :  { %2423 = vmatpush.bf16.msrb.mxu0 %v3921_v57 }
 0x13d   :  { %v1878_v61 = vpop.f32.mrf.mxu3 }
 0x13e   :  { %v1865_v60 = vpop.f32.mrf.mxu2  ;;  %v3917_v61 = vld [vmem:[%s4173_s5 + $0x10] sm:$0xff] }
 0x13f   :  { %2424 = vmatpush.bf16.msrb.mxu0 %v3920_v58  ;;  %v3918_v60 = vld [vmem:[%s4173_s5 + $0x18] sm:$0xff] }
 0x143   :  { %2425 = vmatpush.bf16.msrb.mxu0 %v3919_v59 }
 0x147   :  { %2426 = vmatpush.bf16.msrb.mxu0 %v3918_v60 }
 0x14b   :  { %2427 = vmatpush.bf16.msrb.mxu0 %v3917_v61 }
 0x14d   :  { %v1889_v0 = vpop.f32.mrf.mxu0  ;;  %v1902_v2 = vpop.f32.mrf.mxu1 }
 0x14e   :  { %v1890_v1 = vadd.f32 %v1889_v0, %v1877_v63  ;;  %v3915_v63 = vld [vmem:[%s4173_s5] sm:$0xff] }
 0x14f   :  { %2428 = vmatpush.bf16.msrb.mxu0 %v3916_v8 }
 0x150   :  { %v1903_v3 = vadd.f32 %v1902_v2, %v1890_v1 }
 0x153   :  { %2429 = vmatpush.bf16.msrb.mxu0 %v3915_v63 }
 0x155   :  { %v1928_v5 = vpop.f32.mrf.mxu3  ;;  %v1891_v12 = vpop.f32.mrf.mxu0 }
 0x156   :  { %v1915_v15 = vpop.f32.mrf.mxu2  ;;  %v1904_v14 = vpop.f32.mrf.mxu1 }
 0x157   :  { %v1916_v25 = vadd.f32 %v1915_v15, %v1903_v3 }
 0x159   :  { %v1929_v11 = vadd.f32 %v1928_v5, %v1916_v25  ;;  %v3930_v25 = vld [vmem:[%s4174_s6] ss:$0 sm:$0xff] }
 0x15b   :  { %v2038_v16 = vpack.c.bf16 %v1929_v11, %v1929_v11 }
 0x15d   :  { %2334 = vmatmul.bf16.vlgmr.msra.gmra.mxu2 %v2038_v16  ;;  %v1930_v4 = vpop.f32.mrf.mxu3 }
 0x15e   :  { %v1917_v18 = vpop.f32.mrf.mxu2 }
 0x16d   :  { %v1941_v13 = vpop.f32.mrf.mxu0  ;;  %v1954_v22 = vpop.f32.mrf.mxu1 }
 0x16e   :  { %v1942_v29 = vadd.f32 %v1941_v13, %v335_v26 }
 0x170   :  { %v1955_v30 = vadd.f32 %v1954_v22, %v1942_v29 }
 0x175   :  { %v1980_v40 = vpop.f32.mrf.mxu3  ;;  %v1943_v38 = vpop.f32.mrf.mxu0 }
 0x176   :  { %v1967_v23 = vpop.f32.mrf.mxu2  ;;  %v1956_v24 = vpop.f32.mrf.mxu1 }
 0x177   :  { %v1968_v31 = vadd.f32 %v1967_v23, %v1955_v30 }
 0x179   :  { %v1981_v32 = vadd.f32 %v1980_v40, %v1968_v31 }
 0x17d   :  { %v1982_v28 = vpop.f32.mrf.mxu3 }
 0x17e   :  { %v1969_v27 = vpop.f32.mrf.mxu2 }
 0x18d   :  { %v1993_v33 = vpop.f32.mrf.mxu0  ;;  %v2006_v35 = vpop.f32.mrf.mxu1 }
 0x18e   :  { %v1994_v36 = vadd.f32 %v1993_v33, %v1981_v32 }
 0x190   :  { %v2007_v7 = vadd.f32 %v2006_v35, %v1994_v36 }
 0x195   :  { %v2019_v39 = vpop.f32.mrf.mxu2  ;;  %v2032_v42 = vpop.f32.mrf.mxu3 }
 0x196   :  { %v2020_v41 = vadd.f32 %v2019_v39, %v2007_v7  ;;  %v1995_v43 = vpop.f32.mrf.mxu0  ;;  %v2008_v44 = vpop.f32.mrf.mxu1 }
 0x198   :  { %v2033_v45 = vadd.f32 %v2032_v42, %v2020_v41 }
 0x19a   :  { %v2039_v46 = vpack.c.bf16 %v2033_v45, %v2033_v45 }
 0x19c   :  { %2347 = vmatmul.bf16.vlgmr.msra.gmra.mxu3 %v2039_v46 }
 0x19d   :  { %v2021_v47 = vpop.f32.mrf.mxu2  ;;  %v2034_v6 = vpop.f32.mrf.mxu3 }
 0x1ad   :  { %v2309_v50 = vpop.f32.mrf.mxu0  ;;  %v2322_v52 = vpop.f32.mrf.mxu1 }
 0x1ae   :  { %v2310_v51 = vadd.f32 %v3929_v49, %v2309_v50 }
 0x1b0   :  { %v2323_v53 = vadd.f32 %v2322_v52, %v2310_v51 }
 0x1b5   :  { %v2311_v54 = vpop.f32.mrf.mxu0  ;;  %v2324_v55 = vpop.f32.mrf.mxu1 }
 0x1e0   :  { %v2335_v48 = vpop.f32.mrf.mxu2 }
 0x1e1   :  { %v2336_v0 = vadd.f32 %v2335_v48, %v2323_v53 }
 0x1e8   :  { %v2337_v62 = vpop.f32.mrf.mxu2 }
 0x21f   :  { %v2348_v1 = vpop.f32.mrf.mxu3 }
 0x220   :  { %v2349_v2 = vadd.f32 %v2348_v1, %v2336_v0 }
 0x222   :  { %v2352_v3 = vmax.f32 %v2349_v2, 0.0 }
 0x224   :  { %v2353_v9 = vpack.c.bf16 %v2352_v3, %v2352_v3 }
 0x226   :  { %2430 = vmatmul.bf16.vlgmr.msrb.gmra.mxu0 %v2353_v9 }
 0x227   :  { %v2350_v15 = vpop.f32.mrf.mxu3 }
 0x2a3   :  { %v2431_v5 = vpop.f32.mrf.mxu0 }
 0x2a4   :  { %v2432_v10 = vadd.f32 %v3930_v25, %v2431_v5 }
 0x2a6   :  { %v2435_v11 = vpack.c.bf16 %v2432_v10, %v2432_v10 }
 0x2a8   :  { %2436 = vst [vmem:[%s4175_s7] sm:$0xf] %v2435_v11 }
 0x2ab   :  { %v2433_v12 = vpop.f32.mrf.mxu0 }
 0x2ac   :  { %2441 = vsyncpa [#allocation3], 1 }
 0x2ad   :  { %2442 = vsyncpa [#allocation5], 1 }

</bundles_post_ra>
